<compile_context>
chip_gen: v5e
topology: v5e:2x2
jax: 0.10.0
libtpu: 0.0.40
codegen_flags: <defaults>
</compile_context>

<pallas_src>
import functools

import jax
import jax.numpy as jnp
from jax.experimental import pallas as pl
from jax.experimental.pallas import tpu as pltpu

BN_EPS = 1e-5
LATENT = 100
SIZES = [(LATENT, 512), (512, 256), (256, 128), (128, 64), (64, 1)]

LANE = 128
_LATENT_PAD = ((LATENT + LANE - 1) // LANE) * LANE   # 100 -> 128
_F4_PAD = LANE                                       # 64  -> 128

# Static lane offsets of the packed (1, 1152) bias / w5-row slab (all
# offsets are multiples of 128 -> zero-cost lane-aligned slices).
_OFF_B1, _OFF_B2, _OFF_B3, _OFF_B4, _OFF_W5, _ROW_TOTAL = 0, 512, 768, 896, 1024, 1152

# dot_general dims contracting the LAST axis of both operands:
# (B, K) x (N, K) -> (B, N).  Keeping weights (out, in) lets the runtime BN
# scale (a (1, K) lane vector) broadcast over W with no transpose.
_DIMS = (((1,), (1,)), ((), ()))


def _mish(x, *, approx):
    # mish(x) = x * tanh(softplus(x)) = x * t*(t+2)/(t*(t+2)+2),  t = exp(x).
    # One EUP exp + one EUP reciprocal; the clamp keeps exp finite (for
    # x >= 20, mish(x) == x to f32 precision).
    t = jnp.exp(jnp.minimum(x, 20.0))
    num = t * (t + 2.0)
    return x * num * pl.reciprocal(num + 2.0, approx=approx)


def _bn_stats(h):
    # One-pass biased batch statistics (PyTorch BatchNorm1d training mode).
    mean = jnp.mean(h, axis=0, keepdims=True)
    meansq = jnp.mean(h * h, axis=0, keepdims=True)
    var = jnp.maximum(meansq - mean * mean, 0.0)      # guard f32 cancellation
    return mean, jax.lax.rsqrt(var + BN_EPS)


def discriminator2_kernel(x_ref, w1_ref, w2_ref, w34_ref, row_ref, sc_ref,
                          o_ref, *, mm_dtype, approx):
    f32 = jnp.float32
    b1 = row_ref[:, _OFF_B1:_OFF_B2]
    b2 = row_ref[:, _OFF_B2:_OFF_B3]
    b3 = row_ref[:, _OFF_B3:_OFF_B4]
    b4 = row_ref[:, _OFF_B4:_OFF_W5]
    w5r = row_ref[:, _OFF_W5:_ROW_TOTAL]
    w3 = w34_ref[:, 0:256]
    w4 = w34_ref[:, 256:384]

    def bn_linear(h, w, b):
        # BatchNorm of h folded into the next Linear:
        #   ((h - mean) * s) @ W.T + b == h @ (s*W).T + (b - mean @ (s*W).T)
        # Per-element cost is only h*h for the stats; weight scaling (N*K)
        # and the bias matvec are batch independent.
        mean, s = _bn_stats(h)
        w_s = w * s                                    # (N, K) * (1, K)
        bias = b - jax.lax.dot_general(mean, w_s, _DIMS,
                                       preferred_element_type=f32)
        return jax.lax.dot_general(h.astype(mm_dtype), w_s.astype(mm_dtype),
                                   _DIMS, preferred_element_type=f32) + bias

    # Layer 1 (no preceding BN); x is zero-padded to 128 lanes (exact).
    h = jax.lax.dot_general(x_ref[...].astype(mm_dtype),
                            w1_ref[...].astype(mm_dtype), _DIMS,
                            preferred_element_type=f32) + b1
    h = _mish(h, approx=approx)
    # Layers 2-4: runtime BN fold; BN affine was folded into W/b at trace time.
    h = _mish(bn_linear(h, w2_ref[...], b2), approx=approx)
    h = _mish(bn_linear(h, w3, b3), approx=approx)
    h = _mish(bn_linear(h, w4, b4), approx=approx)     # (B,128); lanes 64+ exactly 0

    # Layer 5 ((padded) 128 -> 1): BN4 fold + VPU multiply + lane reduction
    # instead of an N=1 MXU pass.
    mean, s = _bn_stats(h)
    w5s = w5r * s                                      # (1, 128)
    b5 = sc_ref[0] - jnp.sum(mean * w5s, axis=-1, keepdims=True)
    z = jnp.sum(h * w5s, axis=-1, keepdims=True) + b5  # (B, 1)
    h5 = _mish(z, approx=approx)
    # BN5 (single feature) folded into its own affine, then a stable sigmoid.
    m5, s5 = _bn_stats(h5)
    a = s5 * sc_ref[1]
    c = sc_ref[2] - m5 * a
    zz = h5 * a + c
    # TODO(synk): lane-dense (ceil(B/128), 128) tail layout (masked stats) for
    # batch >= 4k; negligible at small batch.
    t = jnp.exp(-jnp.abs(zz))
    inv = pl.reciprocal(1.0 + t, approx=approx)
    o_ref[...] = jnp.where(zz >= 0.0, inv, t * inv)


def _fold_affine(gamma_prev, beta_prev, w, b):
    """Fold y = hn*gamma + beta followed by y @ W + b into hn @ W' + b' (exact)."""
    return gamma_prev.reshape(-1, 1) * w, b + beta_prev @ w


def _physical_vmem_bytes():
    try:
        info = pltpu.get_tpu_info()
        for name in ("vmem_capacity_bytes", "vmem_bytes", "vmem_size_bytes"):
            v = getattr(info, name, None)
            if v:
                return int(v)
    except Exception:
        pass
    return 64 << 20          # conservative fallback (v7x per-TC VMEM)


def discriminator2(x, params, *, matmul_dtype=jnp.float32, approx_recip=None):
    """Discriminator2 forward (training-mode BatchNorm batch statistics).

    params: list of 5 tuples (W (in,out), b (1,out), gamma (1,out), beta (1,out)).
    matmul_dtype=jnp.bfloat16 is the recommended fast path on v5e/v6e/v7x
    (MXU-native bf16 operands); Mish/BN/statistics math always stays f32.
    Throughput note: feed batch >= 256 (>= 128 on v5e), or stack independent
    forward passes along the batch axis -- tiny batches are overhead bound.
    """
    if approx_recip is None:
        approx_recip = matmul_dtype != jnp.float32
    f32 = jnp.float32
    md = matmul_dtype

    (w1, b1, g1, be1), (w2, b2, g2, be2), (w3, b3, g3, be3), \
        (w4, b4, g4, be4), (w5, b5, g5, be5) = params
    batch = x.shape[0]

    # --- trace-time refactoring (exact): padding + BN-affine folding ---
    x_p = jnp.pad(x.astype(f32), ((0, 0), (0, _LATENT_PAD - LATENT)))
    w1_p = jnp.pad(w1, ((0, _LATENT_PAD - LATENT), (0, 0)))          # (128, 512)

    w2_f, b2_f = _fold_affine(g1, be1, w2, b2)
    w3_f, b3_f = _fold_affine(g2, be2, w3, b3)
    w4_f, b4_f = _fold_affine(g3, be3, w4, b4)

    pad4 = _F4_PAD - w4_f.shape[1]
    w4_f = jnp.pad(w4_f, ((0, 0), (0, pad4)))                        # (128, 128)
    b4_f = jnp.pad(b4_f, ((0, 0), (0, pad4)))
    g4_p = jnp.pad(g4, ((0, 0), (0, pad4)))
    be4_p = jnp.pad(be4, ((0, 0), (0, pad4)))
    w5_p = jnp.pad(w5, ((0, pad4), (0, 0)))                          # (128, 1)
    w5_f, b5_f = _fold_affine(g4_p, be4_p, w5_p, b5)                 # (128,1),(1,1)
    w5_row = w5_f.reshape(1, _F4_PAD)

    # (out, in) weight layout; pack small operands into slabs.
    w1_t = w1_p.T.astype(f32)                                        # (512, 128)
    w2_t = w2_f.T.astype(f32)                                        # (256, 512)
    w34 = jnp.concatenate([w3_f.T, w4_f.T], axis=1).astype(f32)      # (128, 384)
    row_slab = jnp.concatenate([b1, b2_f, b3_f, b4_f, w5_row],
                               axis=1).astype(f32)                   # (1, 1152)
    scalars = jnp.concatenate([b5_f.reshape(-1), g5.reshape(-1),
                               be5.reshape(-1)]).astype(f32)         # (3,) SMEM
    operands = [x_p, w1_t, w2_t, w34, row_slab, scalars]

    # --- generation-aware VMEM budgeting (whole-batch, no-grid design) ---
    phys = _physical_vmem_bytes()
    weight_bytes = sum(int(a.size) * a.dtype.itemsize
                       for a in (w1_t, w2_t, w34, row_slab))
    act_bytes = 4 * batch * (512 + 256 + 128 + _F4_PAD + 1) * 2
    vmem_needed = int(x_p.size) * 4 + 3 * weight_bytes + act_bytes + 4 * batch
    budget = int(phys * 0.85)
    if vmem_needed > budget:
        # TODO(synk): batch-tiled two-pass BatchNorm pipeline (phase 1: per-tile
        # Linear+Mish with sum/sumsq accumulation; phase 2: normalized matmul of
        # the next layer) with a parallel batch grid axis; removes this ceiling
        # and uses both TensorCores on v7x.
        raise ValueError(
            f"batch={batch} needs ~{vmem_needed >> 20} MiB VMEM "
            f"(~{budget >> 20} MiB budget on this chip); split the batch "
            "across calls for this whole-batch-resident kernel.")
    vmem_limit = int(min(max(vmem_needed + (4 << 20), 16 << 20),
                         phys - (4 << 20)))

    # Advisory cost estimate (post-rewrite: ~6 VPU + 2 EUP ops per activation).
    mm_flops = 2 * batch * (_LATENT_PAD * 512 + 512 * 256 + 256 * 128
                            + 128 * _F4_PAD + _F4_PAD)
    fold_flops = 2 * (512 * 256 + 256 * 128 + 128 * 128 + 128)
    n_act = batch * (512 + 256 + 128 + _F4_PAD + 1)
    cost = pl.CostEstimate(
        flops=int(mm_flops + fold_flops + 6 * n_act),
        transcendentals=int(2 * n_act + 2 * batch),
        bytes_accessed=int(int(x_p.size) * 4 + weight_bytes + 4 * batch))

    vmem = pl.BlockSpec(memory_space=pltpu.MemorySpace.VMEM)
    smem = pl.BlockSpec(memory_space=pltpu.MemorySpace.SMEM)
    kernel = functools.partial(discriminator2_kernel,
                               mm_dtype=md, approx=approx_recip)
    return pl.pallas_call(
        kernel,
        out_shape=jax.ShapeDtypeStruct((batch, 1), jnp.float32),
        in_specs=[vmem, vmem, vmem, vmem, vmem, smem],
        out_specs=vmem,
        compiler_params=pltpu.CompilerParams(vmem_limit_bytes=vmem_limit),
        cost_estimate=cost,
    )(*operands)


def init_params(key):
    """Deterministic synthetic init (stand-in for utils.init_weights)."""
    params = []
    for (fi, fo) in SIZES:
        key, wk, bk, gk, bek = jax.random.split(key, 5)
        w = 0.02 * jax.random.normal(wk, (fi, fo), dtype=jnp.float32)
        b = 0.01 * jax.random.normal(bk, (1, fo), dtype=jnp.float32)
        gamma = 1.0 + 0.1 * jax.random.normal(gk, (1, fo), dtype=jnp.float32)
        beta = 0.05 * jax.random.normal(bek, (1, fo), dtype=jnp.float32)
        params.append((w, b, gamma, beta))
    return params


def reference(x, params):
    """Pure-JAX reference with the original (unfolded, un-padded) math."""
    h = x.astype(jnp.float32)
    for (w, b, g, be) in params:
        h = jnp.dot(h, w, precision=jax.lax.Precision.HIGHEST) + b
        sp = jnp.maximum(h, 0.0) + jnp.log1p(jnp.exp(-jnp.abs(h)))   # softplus
        h = h * jnp.tanh(sp)                                         # Mish
        mean = jnp.mean(h, axis=0, keepdims=True)
        var = jnp.mean((h - mean) ** 2, axis=0, keepdims=True)
        h = (h - mean) * jax.lax.rsqrt(var + BN_EPS)
        h = h * g + be                                               # BN affine
    return jax.nn.sigmoid(h)


if __name__ == "__main__":
    key = jax.random.PRNGKey(0)
    key, xk = jax.random.split(key)
    batch = 8
    x = jax.random.normal(xk, (batch, LATENT), dtype=jnp.float32)
    params = init_params(key)

    ref = jax.block_until_ready(reference(x, params))

    # Precision path: f32 MXU operands (faithful to the PyTorch f32 forward).
    out = jax.block_until_ready(discriminator2(x, params))
    assert out.shape == (batch, 1), out.shape
    assert jnp.allclose(out, ref, atol=2e-3, rtol=2e-3), (out, ref)

    # Fast path (recommended on v5e/v6e/v7x): bf16 MXU operands + approx recip.
    out_fast = jax.block_until_ready(
        discriminator2(x, params, matmul_dtype=jnp.bfloat16))
    assert out_fast.shape == (batch, 1), out_fast.shape
    assert jnp.allclose(out_fast, ref, atol=5e-2, rtol=5e-2), (out_fast, ref)

    print("KERNEL_OK")
</pallas_src>

<mosaic_0001>
module attributes {stable_mosaic.version = 11 : i64} {
  func.func @discriminator2_kernel(%arg0: memref<8x128xf32, #tpu.memory_space<vmem>>, %arg1: memref<512x128xf32, #tpu.memory_space<vmem>>, %arg2: memref<256x512xf32, #tpu.memory_space<vmem>>, %arg3: memref<128x384xf32, #tpu.memory_space<vmem>>, %arg4: memref<1x1152xf32, #tpu.memory_space<vmem>>, %arg5: memref<3xf32, #tpu.memory_space<smem>>, %arg6: memref<8x1xf32, #tpu.memory_space<vmem>>) attributes {dimension_semantics = [], scalar_prefetch = 0 : i64, scratch_operands = 0 : i64, tpu.core_type = #tpu.core_type<tc>} {
    %c0 = arith.constant 0 : index
    %c0_0 = arith.constant 0 : index
    %0 = vector.load %arg4[%c0, %c0_0] : memref<1x1152xf32, #tpu.memory_space<vmem>>, vector<1x512xf32>
    %c0_1 = arith.constant 0 : index
    %c512 = arith.constant 512 : index
    %1 = vector.load %arg4[%c0_1, %c512] : memref<1x1152xf32, #tpu.memory_space<vmem>>, vector<1x256xf32>
    %c0_2 = arith.constant 0 : index
    %c768 = arith.constant 768 : index
    %2 = vector.load %arg4[%c0_2, %c768] : memref<1x1152xf32, #tpu.memory_space<vmem>>, vector<1x128xf32>
    %c0_3 = arith.constant 0 : index
    %c896 = arith.constant 896 : index
    %3 = vector.load %arg4[%c0_3, %c896] : memref<1x1152xf32, #tpu.memory_space<vmem>>, vector<1x128xf32>
    %c0_4 = arith.constant 0 : index
    %c1024 = arith.constant 1024 : index
    %4 = vector.load %arg4[%c0_4, %c1024] : memref<1x1152xf32, #tpu.memory_space<vmem>>, vector<1x128xf32>
    %c0_5 = arith.constant 0 : index
    %c0_6 = arith.constant 0 : index
    %5 = vector.load %arg3[%c0_5, %c0_6] : memref<128x384xf32, #tpu.memory_space<vmem>>, vector<128x256xf32>
    %c0_7 = arith.constant 0 : index
    %c256 = arith.constant 256 : index
    %6 = vector.load %arg3[%c0_7, %c256] : memref<128x384xf32, #tpu.memory_space<vmem>>, vector<128x128xf32>
    %c0_8 = arith.constant 0 : index
    %c0_9 = arith.constant 0 : index
    %7 = vector.load %arg0[%c0_8, %c0_9] : memref<8x128xf32, #tpu.memory_space<vmem>>, vector<8x128xf32>
    %c0_10 = arith.constant 0 : index
    %c0_11 = arith.constant 0 : index
    %8 = vector.load %arg1[%c0_10, %c0_11] : memref<512x128xf32, #tpu.memory_space<vmem>>, vector<512x128xf32>
    %cst = arith.constant dense<0.000000e+00> : vector<8x512xf32>
    %9 = tpu.matmul %7, %8, %cst {dimension_numbers = #tpu.dot_dimension_numbers<[1], [1], [0], [0], [0, 0, 1, 0], [], []>} : vector<8x128xf32>, vector<512x128xf32>, vector<8x512xf32> -> vector<8x512xf32>
    %10 = vector.broadcast %0 : vector<1x512xf32> to vector<8x512xf32>
    %11 = arith.addf %9, %10 : vector<8x512xf32>
    %cst_12 = arith.constant 2.000000e+01 : f32
    %12 = vector.broadcast %cst_12 : f32 to vector<8x512xf32>
    %13 = arith.minimumf %11, %12 : vector<8x512xf32>
    %14 = math.exp %13 : vector<8x512xf32>
    %cst_13 = arith.constant 2.000000e+00 : f32
    %15 = vector.broadcast %cst_13 : f32 to vector<8x512xf32>
    %16 = arith.addf %14, %15 : vector<8x512xf32>
    %17 = arith.mulf %14, %16 : vector<8x512xf32>
    %18 = arith.mulf %11, %17 : vector<8x512xf32>
    %cst_14 = arith.constant 2.000000e+00 : f32
    %19 = vector.broadcast %cst_14 : f32 to vector<8x512xf32>
    %20 = arith.addf %17, %19 : vector<8x512xf32>
    %21 = tpu.reciprocal %20 : vector<8x512xf32> -> vector<8x512xf32>
    %22 = arith.mulf %18, %21 : vector<8x512xf32>
    %c0_15 = arith.constant 0 : index
    %c0_16 = arith.constant 0 : index
    %23 = vector.load %arg2[%c0_15, %c0_16] : memref<256x512xf32, #tpu.memory_space<vmem>>, vector<256x512xf32>
    %cst_17 = arith.constant dense<0.000000e+00> : vector<512xf32>
    %24 = vector.multi_reduction <add>, %22, %cst_17 [0] : vector<8x512xf32> to vector<512xf32>
    %25 = vector.shape_cast %24 : vector<512xf32> to vector<1x512xf32>
    %cst_18 = arith.constant 8.000000e+00 : f32
    %26 = vector.broadcast %cst_18 : f32 to vector<1x512xf32>
    %27 = arith.divf %25, %26 : vector<1x512xf32>
    %28 = arith.mulf %22, %22 : vector<8x512xf32>
    %cst_19 = arith.constant dense<0.000000e+00> : vector<512xf32>
    %29 = vector.multi_reduction <add>, %28, %cst_19 [0] : vector<8x512xf32> to vector<512xf32>
    %30 = vector.shape_cast %29 : vector<512xf32> to vector<1x512xf32>
    %cst_20 = arith.constant 8.000000e+00 : f32
    %31 = vector.broadcast %cst_20 : f32 to vector<1x512xf32>
    %32 = arith.divf %30, %31 : vector<1x512xf32>
    %33 = arith.mulf %27, %27 : vector<1x512xf32>
    %34 = arith.subf %32, %33 : vector<1x512xf32>
    %cst_21 = arith.constant 0.000000e+00 : f32
    %35 = vector.broadcast %cst_21 : f32 to vector<1x512xf32>
    %36 = arith.maximumf %34, %35 : vector<1x512xf32>
    %cst_22 = arith.constant 9.99999974E-6 : f32
    %37 = vector.broadcast %cst_22 : f32 to vector<1x512xf32>
    %38 = arith.addf %36, %37 : vector<1x512xf32>
    %39 = math.rsqrt %38 : vector<1x512xf32>
    %40 = vector.broadcast %39 : vector<1x512xf32> to vector<256x512xf32>
    %41 = arith.mulf %23, %40 : vector<256x512xf32>
    %cst_23 = arith.constant dense<0.000000e+00> : vector<1x256xf32>
    %42 = tpu.matmul %27, %41, %cst_23 {dimension_numbers = #tpu.dot_dimension_numbers<[1], [1], [0], [0], [0, 0, 1, 0], [], []>} : vector<1x512xf32>, vector<256x512xf32>, vector<1x256xf32> -> vector<1x256xf32>
    %43 = arith.subf %1, %42 : vector<1x256xf32>
    %cst_24 = arith.constant dense<0.000000e+00> : vector<8x256xf32>
    %44 = tpu.matmul %22, %41, %cst_24 {dimension_numbers = #tpu.dot_dimension_numbers<[1], [1], [0], [0], [0, 0, 1, 0], [], []>} : vector<8x512xf32>, vector<256x512xf32>, vector<8x256xf32> -> vector<8x256xf32>
    %45 = vector.broadcast %43 : vector<1x256xf32> to vector<8x256xf32>
    %46 = arith.addf %44, %45 : vector<8x256xf32>
    %cst_25 = arith.constant 2.000000e+01 : f32
    %47 = vector.broadcast %cst_25 : f32 to vector<8x256xf32>
    %48 = arith.minimumf %46, %47 : vector<8x256xf32>
    %49 = math.exp %48 : vector<8x256xf32>
    %cst_26 = arith.constant 2.000000e+00 : f32
    %50 = vector.broadcast %cst_26 : f32 to vector<8x256xf32>
    %51 = arith.addf %49, %50 : vector<8x256xf32>
    %52 = arith.mulf %49, %51 : vector<8x256xf32>
    %53 = arith.mulf %46, %52 : vector<8x256xf32>
    %cst_27 = arith.constant 2.000000e+00 : f32
    %54 = vector.broadcast %cst_27 : f32 to vector<8x256xf32>
    %55 = arith.addf %52, %54 : vector<8x256xf32>
    %56 = tpu.reciprocal %55 : vector<8x256xf32> -> vector<8x256xf32>
    %57 = arith.mulf %53, %56 : vector<8x256xf32>
    %cst_28 = arith.constant dense<0.000000e+00> : vector<256xf32>
    %58 = vector.multi_reduction <add>, %57, %cst_28 [0] : vector<8x256xf32> to vector<256xf32>
    %59 = vector.shape_cast %58 : vector<256xf32> to vector<1x256xf32>
    %cst_29 = arith.constant 8.000000e+00 : f32
    %60 = vector.broadcast %cst_29 : f32 to vector<1x256xf32>
    %61 = arith.divf %59, %60 : vector<1x256xf32>
    %62 = arith.mulf %57, %57 : vector<8x256xf32>
    %cst_30 = arith.constant dense<0.000000e+00> : vector<256xf32>
    %63 = vector.multi_reduction <add>, %62, %cst_30 [0] : vector<8x256xf32> to vector<256xf32>
    %64 = vector.shape_cast %63 : vector<256xf32> to vector<1x256xf32>
    %cst_31 = arith.constant 8.000000e+00 : f32
    %65 = vector.broadcast %cst_31 : f32 to vector<1x256xf32>
    %66 = arith.divf %64, %65 : vector<1x256xf32>
    %67 = arith.mulf %61, %61 : vector<1x256xf32>
    %68 = arith.subf %66, %67 : vector<1x256xf32>
    %cst_32 = arith.constant 0.000000e+00 : f32
    %69 = vector.broadcast %cst_32 : f32 to vector<1x256xf32>
    %70 = arith.maximumf %68, %69 : vector<1x256xf32>
    %cst_33 = arith.constant 9.99999974E-6 : f32
    %71 = vector.broadcast %cst_33 : f32 to vector<1x256xf32>
    %72 = arith.addf %70, %71 : vector<1x256xf32>
    %73 = math.rsqrt %72 : vector<1x256xf32>
    %74 = vector.broadcast %73 : vector<1x256xf32> to vector<128x256xf32>
    %75 = arith.mulf %5, %74 : vector<128x256xf32>
    %cst_34 = arith.constant dense<0.000000e+00> : vector<1x128xf32>
    %76 = tpu.matmul %61, %75, %cst_34 {dimension_numbers = #tpu.dot_dimension_numbers<[1], [1], [0], [0], [0, 0, 1, 0], [], []>} : vector<1x256xf32>, vector<128x256xf32>, vector<1x128xf32> -> vector<1x128xf32>
    %77 = arith.subf %2, %76 : vector<1x128xf32>
    %cst_35 = arith.constant dense<0.000000e+00> : vector<8x128xf32>
    %78 = tpu.matmul %57, %75, %cst_35 {dimension_numbers = #tpu.dot_dimension_numbers<[1], [1], [0], [0], [0, 0, 1, 0], [], []>} : vector<8x256xf32>, vector<128x256xf32>, vector<8x128xf32> -> vector<8x128xf32>
    %79 = vector.broadcast %77 : vector<1x128xf32> to vector<8x128xf32>
    %80 = arith.addf %78, %79 : vector<8x128xf32>
    %cst_36 = arith.constant 2.000000e+01 : f32
    %81 = vector.broadcast %cst_36 : f32 to vector<8x128xf32>
    %82 = arith.minimumf %80, %81 : vector<8x128xf32>
    %83 = math.exp %82 : vector<8x128xf32>
    %cst_37 = arith.constant 2.000000e+00 : f32
    %84 = vector.broadcast %cst_37 : f32 to vector<8x128xf32>
    %85 = arith.addf %83, %84 : vector<8x128xf32>
    %86 = arith.mulf %83, %85 : vector<8x128xf32>
    %87 = arith.mulf %80, %86 : vector<8x128xf32>
    %cst_38 = arith.constant 2.000000e+00 : f32
    %88 = vector.broadcast %cst_38 : f32 to vector<8x128xf32>
    %89 = arith.addf %86, %88 : vector<8x128xf32>
    %90 = tpu.reciprocal %89 : vector<8x128xf32> -> vector<8x128xf32>
    %91 = arith.mulf %87, %90 : vector<8x128xf32>
    %cst_39 = arith.constant dense<0.000000e+00> : vector<128xf32>
    %92 = vector.multi_reduction <add>, %91, %cst_39 [0] : vector<8x128xf32> to vector<128xf32>
    %93 = vector.shape_cast %92 : vector<128xf32> to vector<1x128xf32>
    %cst_40 = arith.constant 8.000000e+00 : f32
    %94 = vector.broadcast %cst_40 : f32 to vector<1x128xf32>
    %95 = arith.divf %93, %94 : vector<1x128xf32>
    %96 = arith.mulf %91, %91 : vector<8x128xf32>
    %cst_41 = arith.constant dense<0.000000e+00> : vector<128xf32>
    %97 = vector.multi_reduction <add>, %96, %cst_41 [0] : vector<8x128xf32> to vector<128xf32>
    %98 = vector.shape_cast %97 : vector<128xf32> to vector<1x128xf32>
    %cst_42 = arith.constant 8.000000e+00 : f32
    %99 = vector.broadcast %cst_42 : f32 to vector<1x128xf32>
    %100 = arith.divf %98, %99 : vector<1x128xf32>
    %101 = arith.mulf %95, %95 : vector<1x128xf32>
    %102 = arith.subf %100, %101 : vector<1x128xf32>
    %cst_43 = arith.constant 0.000000e+00 : f32
    %103 = vector.broadcast %cst_43 : f32 to vector<1x128xf32>
    %104 = arith.maximumf %102, %103 : vector<1x128xf32>
    %cst_44 = arith.constant 9.99999974E-6 : f32
    %105 = vector.broadcast %cst_44 : f32 to vector<1x128xf32>
    %106 = arith.addf %104, %105 : vector<1x128xf32>
    %107 = math.rsqrt %106 : vector<1x128xf32>
    %108 = vector.broadcast %107 : vector<1x128xf32> to vector<128x128xf32>
    %109 = arith.mulf %6, %108 : vector<128x128xf32>
    %cst_45 = arith.constant dense<0.000000e+00> : vector<1x128xf32>
    %110 = tpu.matmul %95, %109, %cst_45 {dimension_numbers = #tpu.dot_dimension_numbers<[1], [1], [0], [0], [0, 0, 1, 0], [], []>} : vector<1x128xf32>, vector<128x128xf32>, vector<1x128xf32> -> vector<1x128xf32>
    %111 = arith.subf %3, %110 : vector<1x128xf32>
    %cst_46 = arith.constant dense<0.000000e+00> : vector<8x128xf32>
    %112 = tpu.matmul %91, %109, %cst_46 {dimension_numbers = #tpu.dot_dimension_numbers<[1], [1], [0], [0], [0, 0, 1, 0], [], []>} : vector<8x128xf32>, vector<128x128xf32>, vector<8x128xf32> -> vector<8x128xf32>
    %113 = vector.broadcast %111 : vector<1x128xf32> to vector<8x128xf32>
    %114 = arith.addf %112, %113 : vector<8x128xf32>
    %cst_47 = arith.constant 2.000000e+01 : f32
    %115 = vector.broadcast %cst_47 : f32 to vector<8x128xf32>
    %116 = arith.minimumf %114, %115 : vector<8x128xf32>
    %117 = math.exp %116 : vector<8x128xf32>
    %cst_48 = arith.constant 2.000000e+00 : f32
    %118 = vector.broadcast %cst_48 : f32 to vector<8x128xf32>
    %119 = arith.addf %117, %118 : vector<8x128xf32>
    %120 = arith.mulf %117, %119 : vector<8x128xf32>
    %121 = arith.mulf %114, %120 : vector<8x128xf32>
    %cst_49 = arith.constant 2.000000e+00 : f32
    %122 = vector.broadcast %cst_49 : f32 to vector<8x128xf32>
    %123 = arith.addf %120, %122 : vector<8x128xf32>
    %124 = tpu.reciprocal %123 : vector<8x128xf32> -> vector<8x128xf32>
    %125 = arith.mulf %121, %124 : vector<8x128xf32>
    %cst_50 = arith.constant dense<0.000000e+00> : vector<128xf32>
    %126 = vector.multi_reduction <add>, %125, %cst_50 [0] : vector<8x128xf32> to vector<128xf32>
    %127 = vector.shape_cast %126 : vector<128xf32> to vector<1x128xf32>
    %cst_51 = arith.constant 8.000000e+00 : f32
    %128 = vector.broadcast %cst_51 : f32 to vector<1x128xf32>
    %129 = arith.divf %127, %128 : vector<1x128xf32>
    %130 = arith.mulf %125, %125 : vector<8x128xf32>
    %cst_52 = arith.constant dense<0.000000e+00> : vector<128xf32>
    %131 = vector.multi_reduction <add>, %130, %cst_52 [0] : vector<8x128xf32> to vector<128xf32>
    %132 = vector.shape_cast %131 : vector<128xf32> to vector<1x128xf32>
    %cst_53 = arith.constant 8.000000e+00 : f32
    %133 = vector.broadcast %cst_53 : f32 to vector<1x128xf32>
    %134 = arith.divf %132, %133 : vector<1x128xf32>
    %135 = arith.mulf %129, %129 : vector<1x128xf32>
    %136 = arith.subf %134, %135 : vector<1x128xf32>
    %cst_54 = arith.constant 0.000000e+00 : f32
    %137 = vector.broadcast %cst_54 : f32 to vector<1x128xf32>
    %138 = arith.maximumf %136, %137 : vector<1x128xf32>
    %cst_55 = arith.constant 9.99999974E-6 : f32
    %139 = vector.broadcast %cst_55 : f32 to vector<1x128xf32>
    %140 = arith.addf %138, %139 : vector<1x128xf32>
    %141 = math.rsqrt %140 : vector<1x128xf32>
    %142 = arith.mulf %4, %141 : vector<1x128xf32>
    %c0_56 = arith.constant 0 : index
    %143 = memref.load %arg5[%c0_56] : memref<3xf32, #tpu.memory_space<smem>>
    %144 = arith.mulf %129, %142 : vector<1x128xf32>
    %cst_57 = arith.constant dense<0.000000e+00> : vector<1xf32>
    %145 = vector.multi_reduction <add>, %144, %cst_57 [1] : vector<1x128xf32> to vector<1xf32>
    %146 = vector.shape_cast %145 : vector<1xf32> to vector<1x1xf32>
    %147 = vector.broadcast %143 : f32 to vector<1x1xf32>
    %148 = arith.subf %147, %146 : vector<1x1xf32>
    %149 = vector.broadcast %142 : vector<1x128xf32> to vector<8x128xf32>
    %150 = arith.mulf %125, %149 : vector<8x128xf32>
    %cst_58 = arith.constant dense<0.000000e+00> : vector<8xf32>
    %151 = vector.multi_reduction <add>, %150, %cst_58 [1] : vector<8x128xf32> to vector<8xf32>
    %152 = vector.shape_cast %151 : vector<8xf32> to vector<8x1xf32>
    %153 = vector.broadcast %148 : vector<1x1xf32> to vector<8x1xf32>
    %154 = arith.addf %152, %153 : vector<8x1xf32>
    %cst_59 = arith.constant 2.000000e+01 : f32
    %155 = vector.broadcast %cst_59 : f32 to vector<8x1xf32>
    %156 = arith.minimumf %154, %155 : vector<8x1xf32>
    %157 = math.exp %156 : vector<8x1xf32>
    %cst_60 = arith.constant 2.000000e+00 : f32
    %158 = vector.broadcast %cst_60 : f32 to vector<8x1xf32>
    %159 = arith.addf %157, %158 : vector<8x1xf32>
    %160 = arith.mulf %157, %159 : vector<8x1xf32>
    %161 = arith.mulf %154, %160 : vector<8x1xf32>
    %cst_61 = arith.constant 2.000000e+00 : f32
    %162 = vector.broadcast %cst_61 : f32 to vector<8x1xf32>
    %163 = arith.addf %160, %162 : vector<8x1xf32>
    %164 = tpu.reciprocal %163 : vector<8x1xf32> -> vector<8x1xf32>
    %165 = arith.mulf %161, %164 : vector<8x1xf32>
    %cst_62 = arith.constant dense<0.000000e+00> : vector<1xf32>
    %166 = vector.multi_reduction <add>, %165, %cst_62 [0] : vector<8x1xf32> to vector<1xf32>
    %167 = vector.shape_cast %166 : vector<1xf32> to vector<1x1xf32>
    %cst_63 = arith.constant 8.000000e+00 : f32
    %168 = vector.broadcast %cst_63 : f32 to vector<1x1xf32>
    %169 = arith.divf %167, %168 : vector<1x1xf32>
    %170 = arith.mulf %165, %165 : vector<8x1xf32>
    %cst_64 = arith.constant dense<0.000000e+00> : vector<1xf32>
    %171 = vector.multi_reduction <add>, %170, %cst_64 [0] : vector<8x1xf32> to vector<1xf32>
    %172 = vector.shape_cast %171 : vector<1xf32> to vector<1x1xf32>
    %cst_65 = arith.constant 8.000000e+00 : f32
    %173 = vector.broadcast %cst_65 : f32 to vector<1x1xf32>
    %174 = arith.divf %172, %173 : vector<1x1xf32>
    %175 = arith.mulf %169, %169 : vector<1x1xf32>
    %176 = arith.subf %174, %175 : vector<1x1xf32>
    %cst_66 = arith.constant 0.000000e+00 : f32
    %177 = vector.broadcast %cst_66 : f32 to vector<1x1xf32>
    %178 = arith.maximumf %176, %177 : vector<1x1xf32>
    %cst_67 = arith.constant 9.99999974E-6 : f32
    %179 = vector.broadcast %cst_67 : f32 to vector<1x1xf32>
    %180 = arith.addf %178, %179 : vector<1x1xf32>
    %181 = math.rsqrt %180 : vector<1x1xf32>
    %c1 = arith.constant 1 : index
    %182 = memref.load %arg5[%c1] : memref<3xf32, #tpu.memory_space<smem>>
    %183 = vector.broadcast %182 : f32 to vector<1x1xf32>
    %184 = arith.mulf %181, %183 : vector<1x1xf32>
    %c2 = arith.constant 2 : index
    %185 = memref.load %arg5[%c2] : memref<3xf32, #tpu.memory_space<smem>>
    %186 = arith.mulf %169, %184 : vector<1x1xf32>
    %187 = vector.broadcast %185 : f32 to vector<1x1xf32>
    %188 = arith.subf %187, %186 : vector<1x1xf32>
    %189 = vector.broadcast %184 : vector<1x1xf32> to vector<8x1xf32>
    %190 = arith.mulf %165, %189 : vector<8x1xf32>
    %191 = vector.broadcast %188 : vector<1x1xf32> to vector<8x1xf32>
    %192 = arith.addf %190, %191 : vector<8x1xf32>
    %193 = math.absf %192 : vector<8x1xf32>
    %cst_68 = arith.constant 0.000000e+00 : f32
    %194 = vector.broadcast %cst_68 : f32 to vector<8x1xf32>
    %195 = arith.subf %194, %193 : vector<8x1xf32>
    %196 = math.exp %195 : vector<8x1xf32>
    %cst_69 = arith.constant 1.000000e+00 : f32
    %197 = vector.broadcast %cst_69 : f32 to vector<8x1xf32>
    %198 = arith.addf %197, %196 : vector<8x1xf32>
    %199 = tpu.reciprocal %198 : vector<8x1xf32> -> vector<8x1xf32>
    %cst_70 = arith.constant 0.000000e+00 : f32
    %200 = vector.broadcast %cst_70 : f32 to vector<8x1xf32>
    %201 = arith.cmpf oge, %192, %200 : vector<8x1xf32>
    %202 = arith.mulf %196, %199 : vector<8x1xf32>
    %203 = arith.select %201, %199, %202 : vector<8x1xi1>, vector<8x1xf32>
    %c0_71 = arith.constant 0 : index
    %c0_72 = arith.constant 0 : index
    %204 = vector.load %arg6[%c0_71, %c0_72] : memref<8x1xf32, #tpu.memory_space<vmem>>, vector<8x1xf32>
    tpu.vector_store %arg6[%c0_71, %c0_72], %203 {strides = array<i32>} : memref<8x1xf32, #tpu.memory_space<vmem>>, vector<8x1xf32>,
    return
  }
}

</mosaic_0001>

<bundles_post_ra>
// kernel: tpu_custom_call.1
= control target key start
LH: loop header
LB: loop body
LE: loop exit
PB: predicated region body
PF: predicated region fallthrough
CT: control target
= control target key end

     0   :  { %11 = vsyncpa [#allocation3], 0  ;;  %s2735_s0 = inlined_call_operand.hbm [shape: f32[8,128], index: 0, kind: input, shape index: {}]   ;;  %s2736_s1 = inlined_call_operand.hbm [shape: f32[512,128], index: 1, kind: input, shape index: {}]   ;;  %s2737_s2 = inlined_call_operand.hbm [shape: f32[256,512], index: 2, kind: input, shape index: {}]   ;;  %s2738_s3 = inlined_call_operand.hbm [shape: f32[128,384], index: 3, kind: input, shape index: {}]   ;;  %s2739_s4 = inlined_call_operand.hbm [shape: f32[1,1152], index: 4, kind: input, shape index: {}]   ;;  %s2740_s5 = inlined_call_operand.vmem [shape: f32[3], index: 5, kind: input, shape index: {}]   ;;  %s2741_s6 = inlined_call_operand.vmem [shape: f32[8,1], index: 6, kind: output, shape index: {}]  }
   0x1   :  { %12 = vsyncpa [#allocation6], 0 }
   0x2   :  { %13 = vsyncpa [#allocation9], 0  ;;  %s30_s23 = sshll.u32 %s2736_s1, 4  ;;  %s31_s23 = int_to_ptr.hbm [resolvable:$true] %s30_s23 }
   0x3   :  { %14 = vsyncpa [#allocation4], 0  ;;  %s1819_s24 = smov [#allocation5]   ;;  %s56_s28 = sshll.u32 %s2738_s3, 4  ;;  %s57_s28 = int_to_ptr.hbm [resolvable:$true] %s56_s28 }
   0x4   :  { %s32_s25 = sshll.u32 %s1819_s24, 4  ;;  %s1820_s29 = smov 128   ;;  %s33_s25 = int_to_ptr.vmem [resolvable:$true] %s32_s25 }
   0x5   :  { %s1821_s30 = smov 8   ;;  %s1822_s7 = smov [#allocation8]  }
   0x6   :  { %38 = dma.hbm_to_vmem [thread:$0]  %s31_s23, 8192, %s33_s25, [#allocation6], %s1820_s29, %s1820_s29, %s1821_s30  }
   0x7   :  { %s58_s8 = sshll.u32 %s1822_s7, 4  ;;  %s1823_s9 = smov 384   ;;  %s59_s8 = int_to_ptr.vmem [resolvable:$true] %s58_s8 }
   0x8   :  { %s1824_s10 = smov 24   ;;  %s20_s12 = sshll.u32 %s2735_s0, 4  ;;  %s21_s12 = int_to_ptr.hbm [resolvable:$true] %s20_s12 }
   0x9   :  { %64 = dma.hbm_to_vmem [thread:$0]  %s57_s28, 6144, %s59_s8, [#allocation9], %s1823_s9, %s1823_s9, %s1824_s10  }
   0xa   :  { %s1825_s13 = smov [#allocation2]   ;;  %s43_s16 = sshll.u32 %s2737_s2, 4  ;;  %s44_s16 = int_to_ptr.hbm [resolvable:$true] %s43_s16 }
   0xb   :  { %s22_s14 = sshll.u32 %s1825_s13, 4  ;;  %s1826_s17 = smov [#allocation7]   ;;  %s23_s14 = int_to_ptr.vmem [resolvable:$true] %s22_s14 }
   0xc   :  { %25 = dma.hbm_to_vmem [thread:$0]  %s21_s12, 128, %s23_s14, [#allocation3]  }
   0xd   :  { %s45_s18 = sshll.u32 %s1826_s17, 4  ;;  %s1827_s19 = smov 512   ;;  %s46_s18 = int_to_ptr.vmem [resolvable:$true] %s45_s18 }
   0xe   :  { %s1828_s20 = smov 32   ;;  %s70_s0 = sshll.u32 %s2739_s4, 4  ;;  %s71_s0 = int_to_ptr.hbm [resolvable:$true] %s70_s0 }
   0xf   :  { %51 = dma.hbm_to_vmem [thread:$0]  %s44_s16, 16384, %s46_s18, [#allocation6], %s1827_s19, %s1827_s19, %s1828_s20  }
  0x10   :  { %s1829_s23 = smov [#allocation10]   ;;  %s81_s2 = sshll.u32 %s2740_s5, 4  ;;  %s82_s2 = int_to_ptr.vmem [resolvable:$true] %s81_s2 }
  0x11   :  { %s72_s24 = sshll.u32 %s1829_s23, 4  ;;  %s1830_s27 = smov [#allocation11]   ;;  %s73_s24 = int_to_ptr.vmem [resolvable:$true] %s72_s24 }
  0x12   :  { %75 = dma.hbm_to_vmem [thread:$0]  %s71_s0, 144, %s73_s24, [#allocation9]  }
  0x13   :  { %84 = dma.vmem_to_smem %s82_s2, 16, %s1830_s27, [#allocation4]  }
  0x14   :  { %1811 = dma.done.wait [#allocation3], 128  }
  0x15   :  { %1812 = vsyncadd [#allocation3], 4294967168 }
  0x16   :  { %1813 = dma.done.wait [#allocation6], 24576  }
  0x17   :  { %1814 = vsyncadd [#allocation6], 4294942720 }
  0x18   :  { %1815 = dma.done.wait [#allocation9], 6288  }
  0x19   :  { %1816 = vsyncadd [#allocation9], 4294961008 }
  0x1a   :  { %1817 = dma.done.wait [#allocation4], 16  }
  0x1b   :  { %1818 = vsyncadd [#allocation4], 4294967280 }
  0x1c   :  { %109 = sfence }
  0x1d   :  { %v179_v0 = vld [vmem:[#allocation5 + $0x78] sm:$0xff]  ;;  %v178_v4 = vld [vmem:[#allocation5 + $0x70] sm:$0xff]  ;;  %v177_v8 = vld [vmem:[#allocation5 + $0x68] sm:$0xff]  ;;  %s1497_s4 = sld [smem:[#allocation11]] }
  0x1e   :  { %v195_v1 = vld [vmem:[#allocation5 + $0xf8] sm:$0xff]  ;;  %237 = vmatpush.xpose.msra.mxu0 %v179_v0  ;;  %v194_v5 = vld [vmem:[#allocation5 + $0xf0] sm:$0xff]  ;;  %v193_v9 = vld [vmem:[#allocation5 + $0xe8] sm:$0xff]  ;;  %s1604_s5 = sld [smem:[#allocation11 + $0x1]] }
  0x1f   :  { %v211_v2 = vld [vmem:[#allocation5 + $0x178] sm:$0xff]  ;;  %257 = vmatpush.xpose.msra.mxu1 %v195_v1  ;;  %v210_v6 = vld [vmem:[#allocation5 + $0x170] sm:$0xff]  ;;  %v209_v10 = vld [vmem:[#allocation5 + $0x168] sm:$0xff]  ;;  %s1605_s28 = sld [smem:[#allocation11 + $0x2]] }
  0x20   :  { %v227_v3 = vld [vmem:[#allocation5 + $0x1f8] sm:$0xff]  ;;  %277 = vmatpush.xpose.msra.mxu2 %v211_v2  ;;  %v226_v7 = vld [vmem:[#allocation5 + $0x1f0] sm:$0xff]  ;;  %v225_v11 = vld [vmem:[#allocation5 + $0x1e8] sm:$0xff] }
  0x21   :  { %297 = vmatpush.xpose.msra.mxu3 %v227_v3  ;;  %v176_v12 = vld [vmem:[#allocation5 + $0x60] sm:$0xff]  ;;  %v175_v16 = vld [vmem:[#allocation5 + $0x58] sm:$0xff]  ;;  %v174_v20 = vld [vmem:[#allocation5 + $0x50] sm:$0xff] }
  0x22   :  { %238 = vmatpush.xpose.msra.mxu0 %v178_v4  ;;  %v192_v13 = vld [vmem:[#allocation5 + $0xe0] sm:$0xff]  ;;  %v191_v17 = vld [vmem:[#allocation5 + $0xd8] sm:$0xff]  ;;  %v190_v21 = vld [vmem:[#allocation5 + $0xd0] sm:$0xff] }
  0x23   :  { %258 = vmatpush.xpose.msra.mxu1 %v194_v5  ;;  %v208_v14 = vld [vmem:[#allocation5 + $0x160] sm:$0xff]  ;;  %v207_v18 = vld [vmem:[#allocation5 + $0x158] sm:$0xff]  ;;  %v206_v22 = vld [vmem:[#allocation5 + $0x150] sm:$0xff] }
  0x24   :  { %278 = vmatpush.xpose.msra.mxu2 %v210_v6  ;;  %v224_v15 = vld [vmem:[#allocation5 + $0x1e0] sm:$0xff]  ;;  %v223_v19 = vld [vmem:[#allocation5 + $0x1d8] sm:$0xff]  ;;  %v222_v23 = vld [vmem:[#allocation5 + $0x1d0] sm:$0xff] }
  0x25   :  { %298 = vmatpush.xpose.msra.mxu3 %v226_v7  ;;  %v173_v24 = vld [vmem:[#allocation5 + $0x48] sm:$0xff]  ;;  %v172_v28 = vld [vmem:[#allocation5 + $0x40] sm:$0xff]  ;;  %v171_v32 = vld [vmem:[#allocation5 + $0x38] sm:$0xff] }
  0x26   :  { %239 = vmatpush.xpose.msra.mxu0 %v177_v8  ;;  %v189_v25 = vld [vmem:[#allocation5 + $0xc8] sm:$0xff]  ;;  %v188_v29 = vld [vmem:[#allocation5 + $0xc0] sm:$0xff]  ;;  %v187_v33 = vld [vmem:[#allocation5 + $0xb8] sm:$0xff] }
  0x27   :  { %259 = vmatpush.xpose.msra.mxu1 %v193_v9  ;;  %v205_v26 = vld [vmem:[#allocation5 + $0x148] sm:$0xff]  ;;  %v204_v30 = vld [vmem:[#allocation5 + $0x140] sm:$0xff]  ;;  %v203_v34 = vld [vmem:[#allocation5 + $0x138] sm:$0xff] }
  0x28   :  { %279 = vmatpush.xpose.msra.mxu2 %v209_v10  ;;  %v221_v27 = vld [vmem:[#allocation5 + $0x1c8] sm:$0xff]  ;;  %v220_v31 = vld [vmem:[#allocation5 + $0x1c0] sm:$0xff]  ;;  %v219_v35 = vld [vmem:[#allocation5 + $0x1b8] sm:$0xff] }
  0x29   :  { %299 = vmatpush.xpose.msra.mxu3 %v225_v11  ;;  %v170_v36 = vld [vmem:[#allocation5 + $0x30] sm:$0xff]  ;;  %v169_v40 = vld [vmem:[#allocation5 + $0x28] sm:$0xff]  ;;  %v168_v44 = vld [vmem:[#allocation5 + $0x20] sm:$0xff] }
  0x2a   :  { %240 = vmatpush.xpose.msra.mxu0 %v176_v12  ;;  %v186_v37 = vld [vmem:[#allocation5 + $0xb0] sm:$0xff]  ;;  %v185_v41 = vld [vmem:[#allocation5 + $0xa8] sm:$0xff]  ;;  %v184_v45 = vld [vmem:[#allocation5 + $0xa0] sm:$0xff] }
  0x2b   :  { %260 = vmatpush.xpose.msra.mxu1 %v192_v13  ;;  %v202_v38 = vld [vmem:[#allocation5 + $0x130] sm:$0xff]  ;;  %v201_v42 = vld [vmem:[#allocation5 + $0x128] sm:$0xff]  ;;  %v200_v46 = vld [vmem:[#allocation5 + $0x120] sm:$0xff] }
  0x2c   :  { %280 = vmatpush.xpose.msra.mxu2 %v208_v14  ;;  %v218_v39 = vld [vmem:[#allocation5 + $0x1b0] sm:$0xff]  ;;  %v217_v43 = vld [vmem:[#allocation5 + $0x1a8] sm:$0xff]  ;;  %v216_v47 = vld [vmem:[#allocation5 + $0x1a0] sm:$0xff] }
  0x2d   :  { %300 = vmatpush.xpose.msra.mxu3 %v224_v15  ;;  %v167_v48 = vld [vmem:[#allocation5 + $0x18] sm:$0xff]  ;;  %v166_v52 = vld [vmem:[#allocation5 + $0x10] sm:$0xff]  ;;  %v165_v56 = vld [vmem:[#allocation5 + $0x8] sm:$0xff] }
  0x2e   :  { %241 = vmatpush.xpose.msra.mxu0 %v175_v16  ;;  %v183_v49 = vld [vmem:[#allocation5 + $0x98] sm:$0xff]  ;;  %v182_v53 = vld [vmem:[#allocation5 + $0x90] sm:$0xff]  ;;  %v181_v57 = vld [vmem:[#allocation5 + $0x88] sm:$0xff] }
  0x2f   :  { %261 = vmatpush.xpose.msra.mxu1 %v191_v17  ;;  %v199_v50 = vld [vmem:[#allocation5 + $0x118] sm:$0xff]  ;;  %v198_v54 = vld [vmem:[#allocation5 + $0x110] sm:$0xff]  ;;  %v197_v58 = vld [vmem:[#allocation5 + $0x108] sm:$0xff] }
  0x30   :  { %281 = vmatpush.xpose.msra.mxu2 %v207_v18  ;;  %v215_v51 = vld [vmem:[#allocation5 + $0x198] sm:$0xff]  ;;  %v214_v55 = vld [vmem:[#allocation5 + $0x190] sm:$0xff]  ;;  %v213_v59 = vld [vmem:[#allocation5 + $0x188] sm:$0xff]  ;;  %v1831_v18 = vmov 8.0  }
  0x31   :  { %301 = vmatpush.xpose.msra.mxu3 %v223_v19  ;;  %v164_v60 = vld [vmem:[#allocation5] sm:$0xff]  ;;  %v163_v0 = vld [vmem:[#allocation2] sm:$0xff] }
  0x32   :  { %242 = vmatpush.xpose.msra.mxu0 %v174_v20  ;;  %v180_v61 = vld [vmem:[#allocation5 + $0x80] sm:$0xff] }
  0x33   :  { %262 = vmatpush.xpose.msra.mxu1 %v190_v21  ;;  %v196_v62 = vld [vmem:[#allocation5 + $0x100] sm:$0xff] }
  0x34   :  { %282 = vmatpush.xpose.msra.mxu2 %v206_v22  ;;  %v212_v63 = vld [vmem:[#allocation5 + $0x180] sm:$0xff] }
  0x35   :  { %302 = vmatpush.xpose.msra.mxu3 %v222_v23  ;;  %v110_v1 = vld [vmem:[#allocation10] sm:$0xf] }
  0x36   :  { %243 = vmatpush.xpose.msra.mxu0 %v173_v24  ;;  %v229_v2 = vperm.slane %v110_v1, 0  ;;  %v230_v3 = vperm.slane %v110_v1, 1  ;;  %v231_v10 = vperm.slane %v110_v1, 2  ;;  %v232_v11 = vperm.slane %v110_v1, 3 }
  0x37   :  { %263 = vmatpush.xpose.msra.mxu1 %v189_v25 }
  0x38   :  { %283 = vmatpush.xpose.msra.mxu2 %v205_v26 }
  0x39   :  { %303 = vmatpush.xpose.msra.mxu3 %v221_v27 }
  0x3a   :  { %244 = vmatpush.xpose.msra.mxu0 %v172_v28 }
  0x3b   :  { %264 = vmatpush.xpose.msra.mxu1 %v188_v29 }
  0x3c   :  { %284 = vmatpush.xpose.msra.mxu2 %v204_v30 }
  0x3d   :  { %304 = vmatpush.xpose.msra.mxu3 %v220_v31 }
  0x3e   :  { %245 = vmatpush.xpose.msra.mxu0 %v171_v32 }
  0x3f   :  { %265 = vmatpush.xpose.msra.mxu1 %v187_v33 }
  0x40   :  { %285 = vmatpush.xpose.msra.mxu2 %v203_v34 }
  0x41   :  { %305 = vmatpush.xpose.msra.mxu3 %v219_v35 }
  0x42   :  { %246 = vmatpush.xpose.msra.mxu0 %v170_v36 }
  0x43   :  { %266 = vmatpush.xpose.msra.mxu1 %v186_v37 }
  0x44   :  { %286 = vmatpush.xpose.msra.mxu2 %v202_v38 }
  0x45   :  { %306 = vmatpush.xpose.msra.mxu3 %v218_v39 }
  0x46   :  { %247 = vmatpush.xpose.msra.mxu0 %v169_v40 }
  0x47   :  { %267 = vmatpush.xpose.msra.mxu1 %v185_v41 }
  0x48   :  { %287 = vmatpush.xpose.msra.mxu2 %v201_v42 }
  0x49   :  { %307 = vmatpush.xpose.msra.mxu3 %v217_v43 }
  0x4a   :  { %248 = vmatpush.xpose.msra.mxu0 %v168_v44 }
  0x4b   :  { %268 = vmatpush.xpose.msra.mxu1 %v184_v45 }
  0x4c   :  { %288 = vmatpush.xpose.msra.mxu2 %v200_v46 }
  0x4d   :  { %308 = vmatpush.xpose.msra.mxu3 %v216_v47 }
  0x4e   :  { %249 = vmatpush.xpose.msra.mxu0 %v167_v48 }
  0x4f   :  { %269 = vmatpush.xpose.msra.mxu1 %v183_v49 }
  0x50   :  { %289 = vmatpush.xpose.msra.mxu2 %v199_v50 }
  0x51   :  { %309 = vmatpush.xpose.msra.mxu3 %v215_v51 }
  0x52   :  { %250 = vmatpush.xpose.msra.mxu0 %v166_v52 }
  0x53   :  { %270 = vmatpush.xpose.msra.mxu1 %v182_v53 }
  0x54   :  { %290 = vmatpush.xpose.msra.mxu2 %v198_v54 }
  0x55   :  { %310 = vmatpush.xpose.msra.mxu3 %v214_v55 }
  0x56   :  { %251 = vmatpush.xpose.msra.mxu0 %v165_v56 }
  0x57   :  { %271 = vmatpush.xpose.msra.mxu1 %v181_v57 }
  0x58   :  { %291 = vmatpush.xpose.msra.mxu2 %v197_v58 }
  0x59   :  { %311 = vmatpush.xpose.msra.mxu3 %v213_v59 }
  0x5a   :  { %252 = vmatpush.xpose.msra.mxu0 %v164_v60 }
  0x5b   :  { %272 = vmatpush.xpose.msra.mxu1 %v180_v61 }
  0x5c   :  { %292 = vmatpush.xpose.msra.mxu2 %v196_v62 }
  0x5d   :  { %312 = vmatpush.xpose.msra.mxu3 %v212_v63  ;;  %253 = vmatmul.f32.vlgmr.msra.gmra.mxu0 %v163_v0 }
  0x5e   :  { %273 = vmatmul.f32.vlgmr.msra.gmra.mxu1 %v163_v0 }
  0x5f   :  { %293 = vmatmul.f32.vlgmr.msra.gmra.mxu2 %v163_v0 }
  0x60   :  { %313 = vmatmul.f32.vlgmr.msra.gmra.mxu3 %v163_v0 }
  0xda   :  { %v254_v4 = vpop.f32.mrf.mxu0 }
  0xdb   :  { %v274_v5 = vpop.f32.mrf.mxu1  ;;  %v255_v6 = vadd.f32 %v254_v4, %v229_v2 }
  0xdc   :  { %v275_v7 = vadd.f32 %v274_v5, %v230_v3 }
  0xdd   :  { %v317_v8 = vmin.f32 %v255_v6, 20.0 }
  0xde   :  { %v318_v9 = vmin.f32 %v275_v7, 20.0 }
  0xdf   :  { %v321_v12 = vmul.f32 1.442695, %v317_v8 }
  0xe0   :  { %v323_v13 = vmul.f32 1.442695, %v318_v9 }
  0xe1   :  { %1619 = vpow2.f32 %v321_v12 }
  0xe2   :  { %v294_v14 = vpop.f32.mrf.mxu2  ;;  %1621 = vpow2.f32 %v323_v13 }
  0xe3   :  { %v314_v15 = vpop.f32.mrf.mxu3  ;;  %v295_v16 = vadd.f32 %v294_v14, %v231_v10  ;;  %1623 = vrcp.f32 %v1831_v18 }
  0xe4   :  { %v315_v17 = vadd.f32 %v314_v15, %v232_v11 }
  0xe5   :  { %v319_v19 = vmin.f32 %v295_v16, 20.0 }
  0xe6   :  { %v320_v20 = vmin.f32 %v315_v17, 20.0 }
  0xe7   :  { %v325_v21 = vmul.f32 1.442695, %v319_v19  ;;  %v1620_v23 = vpop.eup %1619 }
  0xe8   :  { %v327_v22 = vmul.f32 1.442695, %v320_v20  ;;  %v1622_v24 = vpop.eup %1621  ;;  %v329_v25 = vadd.f32 2.0, %v1620_v23 }
  0xe9   :  { %1625 = vpow2.f32 %v325_v21  ;;  %v1885_v26 = vpop.eup %1623  ;;  %v330_v27 = vadd.f32 2.0, %v1622_v24 }
  0xea   :  { %1627 = vpow2.f32 %v327_v22  ;;  %v333_v28 = vmul.f32 %v1620_v23, %v329_v25  ;;  %v558_v31 = vmul.f32 8.0, %v1885_v26  ;;  %vm562_vm7 = vweird.f32 %v1885_v26 }
  0xeb   :  { %v334_v29 = vmul.f32 %v1622_v24, %v330_v27 }
  0xec   :  { %v341_v30 = vadd.f32 2.0, %v333_v28  ;;  %v559_v35 = vsub.f32 1.0, %v558_v31  ;;  %v337_v52 = vmul.f32 %v333_v28, %v255_v6 }
  0xed   :  { %v342_v32 = vadd.f32 2.0, %v334_v29  ;;  %v338_v56 = vmul.f32 %v334_v29, %v275_v7 }
  0xee   :  { %1629 = vrcp.f32 %v341_v30  ;;  %v560_v41 = vmul.f32 %v1885_v26, %v559_v35  ;;  %v354_v46 = vand.u32 2147483647, %v341_v30  ;;  %v356_v47 = vand.u32 2147483648, %v341_v30 }
  0xef   :  { %v1626_v33 = vpop.eup %1625  ;;  %1631 = vrcp.f32 %v342_v32  ;;  %v368_v50 = vand.u32 2147483647, %v342_v32  ;;  %v370_v51 = vand.u32 2147483648, %v342_v32  ;;  %vm350_vm0 = vweird.f32 %v341_v30 }
  0xf0   :  { %v1628_v34 = vpop.eup %1627  ;;  %v331_v36 = vadd.f32 2.0, %v1626_v33  ;;  %v1896_v53 = vadd.f32 %v1885_v26, %v560_v41  ;;  %vm1898_vm2 = vcmp.eq.f32.partialorder %v354_v46, 8.507059e+37  ;;  %vm364_vm3 = vweird.f32 %v342_v32 }
  0xf1   :  { %v332_v37 = vadd.f32 2.0, %v1628_v34  ;;  %v357_v60 = vor.u32 1.1754944e-38, %v356_v47  ;;  %vm1902_vm5 = vcmp.eq.f32.partialorder %v368_v50, 8.507059e+37  ;;  %v371_v62 = vor.u32 1.1754944e-38, %v370_v51 }
  0xf2   :  { %v335_v38 = vmul.f32 %v1626_v33, %v331_v36  ;;  %v1948_v46 = vsel %vm562_vm7, %v1885_v26, %v1896_v53 }
  0xf3   :  { %v336_v39 = vmul.f32 %v1628_v34, %v332_v37  ;;  %2835 = vst [vmem:[#allocation19_spill] sm:$0xff] %v1948_v46 }
  0xf4   :  { %v1630_v40 = vpop.eup %1629  ;;  %v1889_v42 = vadd.f32 2.0, %v335_v38  ;;  %v339_v1 = vmul.f32 %v335_v38, %v295_v16 }
  0xf5   :  { %v1891_v43 = vadd.f32 2.0, %v336_v39  ;;  %v1632_v44 = vpop.eup %1631  ;;  %v346_v45 = vmul.f32 %v1630_v40, %v341_v30  ;;  %vm351_vm1 = vweird.f32 %v1630_v40  ;;  %v340_v3 = vmul.f32 %v336_v39, %v315_v17 }
  0xf6   :  { %v360_v48 = vmul.f32 %v1632_v44, %v342_v32  ;;  %1633 = vrcp.f32 %v1889_v42  ;;  %vm365_vm4 = vweird.f32 %v1632_v44  ;;  %vm352_vm6 = vmor %vm350_vm0, %vm351_vm1  ;;  %v382_v2 = vand.u32 2147483647, %v1889_v42 }
  0xf7   :  { %v347_v49 = vsub.f32 1.0, %v346_v45  ;;  %1635 = vrcp.f32 %v1891_v43  ;;  %vm366_vm8 = vmor %vm364_vm3, %vm365_vm4  ;;  %vm378_vm9 = vweird.f32 %v1889_v42  ;;  %v384_v7 = vand.u32 2147483648, %v1889_v42 }
  0xf8   :  { %v361_v54 = vsub.f32 1.0, %v360_v48  ;;  %vm392_vm10 = vweird.f32 %v1891_v43  ;;  %v396_v14 = vand.u32 2147483647, %v1891_v43  ;;  %vm1923_vm11 = vcmp.eq.f32.partialorder %v382_v2, 8.507059e+37 }
  0xf9   :  { %v348_v55 = vmul.f32 %v1630_v40, %v347_v49  ;;  %v398_v18 = vand.u32 2147483648, %v1891_v43  ;;  %v385_v29 = vor.u32 1.1754944e-38, %v384_v7 }
  0xfa   :  { %v362_v58 = vmul.f32 %v1632_v44, %v361_v54  ;;  %vm397_vm15 = vcmp.eq.f32.partialorder %v396_v14, 8.507059e+37 }
  0xfb   :  { %v349_v59 = vadd.f32 %v1630_v40, %v348_v55  ;;  %v399_v36 = vor.u32 1.1754944e-38, %v398_v18 }
  0xfc   :  { %v1634_v63 = vpop.eup %1633  ;;  %v363_v0 = vadd.f32 %v1632_v44, %v362_v58 }
  0xfd   :  { %v1636_v4 = vpop.eup %1635  ;;  %v353_v5 = vsel %vm352_vm6, %v1630_v40, %v349_v59  ;;  %v374_v6 = vmul.f32 %v1634_v63, %v1889_v42  ;;  %vm379_vm12 = vweird.f32 %v1634_v63 }
  0xfe   :  { %v358_v8 = vsel %vm1898_vm2, %v357_v60, %v353_v5  ;;  %v367_v9 = vsel %vm366_vm8, %v1632_v44, %v363_v0  ;;  %v388_v10 = vmul.f32 %v1636_v4, %v1891_v43  ;;  %vm393_vm13 = vweird.f32 %v1636_v4  ;;  %vm380_vm14 = vmor %vm378_vm9, %vm379_vm12 }
  0xff   :  { %v1916_v11 = vmul.f32 %v358_v8, %v337_v52  ;;  %v372_v12 = vsel %vm1902_vm5, %v371_v62, %v367_v9  ;;  %v375_v13 = vsub.f32 1.0, %v374_v6  ;;  %vm394_vm0 = vmor %vm392_vm10, %vm393_vm13  ;;  %vm947_vm13 = vcmask 1040384  }
 0x100   :  { %v1921_v15 = vmul.f32 %v372_v12, %v338_v56  ;;  %v389_v17 = vsub.f32 1.0, %v388_v10 }
 0x101   :  { %2830 = vst [vmem:[#allocation16_spill] sm:$0xff] %v1916_v11  ;;  %v533_v19 = vrot.slane %v1916_v11, 4  ;;  %v568_v20 = vmul.f32 %v1916_v11, %v1916_v11  ;;  %v376_v21 = vmul.f32 %v1634_v63, %v375_v13 }
 0x102   :  { %2831 = vst [vmem:[#allocation17_spill] sm:$0xff] %v1921_v15  ;;  %v539_v22 = vrot.slane %v1921_v15, 4  ;;  %v569_v23 = vmul.f32 %v1921_v15, %v1921_v15  ;;  %v390_v24 = vmul.f32 %v1636_v4, %v389_v17 }
 0x103   :  { %v534_v25 = vadd.f32 %v533_v19, %v1916_v11  ;;  %v572_v27 = vrot.slane %v568_v20, 4  ;;  %v377_v28 = vadd.f32 %v1634_v63, %v376_v21  ;;  %v414_v11 = vld [vmem:[#allocation7 + $0x48] sm:$0xff] }
 0x104   :  { %v540_v30 = vadd.f32 %v539_v22, %v1921_v15  ;;  %v578_v31 = vrot.slane %v569_v23, 4  ;;  %v391_v32 = vadd.f32 %v1636_v4, %v390_v24  ;;  %v424_v15 = vld [vmem:[#allocation7 + $0x98] sm:$0xff] }
 0x105   :  { %v535_v33 = vrot.slane %v534_v25, 2  ;;  %v573_v34 = vadd.f32 %v572_v27, %v568_v20  ;;  %v381_v35 = vsel %vm380_vm14, %v1634_v63, %v377_v28 }
 0x106   :  { %v541_v37 = vrot.slane %v540_v30, 2  ;;  %v579_v38 = vadd.f32 %v578_v31, %v569_v23  ;;  %v386_v39 = vsel %vm1923_vm11, %v385_v29, %v381_v35  ;;  %v395_v40 = vsel %vm394_vm0, %v1636_v4, %v391_v32 }
 0x107   :  { %v536_v41 = vadd.f32 %v535_v33, %v534_v25  ;;  %v574_v44 = vrot.slane %v573_v34, 2  ;;  %v1942_v45 = vmul.f32 %v386_v39, %v339_v1  ;;  %v400_v42 = vsel %vm397_vm15, %v399_v36, %v395_v40 }
 0x108   :  { %v542_v43 = vadd.f32 %v541_v37, %v540_v30  ;;  %v580_v47 = vrot.slane %v579_v38, 2  ;;  %v1950_v48 = vmul.f32 %v400_v42, %v340_v3 }
 0x109   :  { %2834 = vst [vmem:[#allocation18_spill] sm:$0xff] %v1942_v45  ;;  %v537_v49 = vrot.slane %v536_v41, 1  ;;  %v575_v50 = vadd.f32 %v574_v44, %v573_v34  ;;  %v545_v51 = vrot.slane %v1942_v45, 4  ;;  %v570_v52 = vmul.f32 %v1942_v45, %v1942_v45 }
 0x10a   :  { %2836 = vst [vmem:[#allocation20_spill] sm:$0xff] %v1950_v48  ;;  %v543_v54 = vrot.slane %v542_v43, 1  ;;  %v581_v55 = vadd.f32 %v580_v47, %v579_v38  ;;  %v551_v56 = vrot.slane %v1950_v48, 4  ;;  %v571_v57 = vmul.f32 %v1950_v48, %v1950_v48 }
 0x10b   :  { %v538_v26 = vadd.f32 %v537_v49, %v536_v41  ;;  %v576_v53 = vrot.slane %v575_v50, 1  ;;  %v546_v58 = vadd.f32 %v545_v51, %v1942_v45  ;;  %v584_v59 = vrot.slane %v570_v52, 4  ;;  %v413_v45 = vld [vmem:[#allocation7 + $0x40] sm:$0xff] }
 0x10c   :  { %v544_v60 = vadd.f32 %v543_v54, %v542_v43  ;;  %v582_v61 = vrot.slane %v581_v55, 1  ;;  %v552_v62 = vadd.f32 %v551_v56, %v1950_v48  ;;  %v590_v63 = vrot.slane %v571_v57, 4  ;;  %v423_v48 = vld [vmem:[#allocation7 + $0x90] sm:$0xff] }
 0x10d   :  { %v1961_v0 = vmul.f32 %v1948_v46, %v538_v26  ;;  %v577_v1 = vadd.f32 %v576_v53, %v575_v50  ;;  %v547_v2 = vrot.slane %v546_v58, 2  ;;  %v585_v3 = vadd.f32 %v584_v59, %v570_v52 }
 0x10e   :  { %v1964_v4 = vmul.f32 %v1948_v46, %v544_v60  ;;  %v583_v5 = vadd.f32 %v582_v61, %v581_v55  ;;  %v553_v6 = vrot.slane %v552_v62, 2  ;;  %v591_v7 = vadd.f32 %v590_v63, %v571_v57  ;;  %v465_v63 = vld [vmem:[#allocation7 + $0x1e0] sm:$0xff] }
 0x10f   :  { %v596_v8 = vmul.f32 %v577_v1, %v1948_v46  ;;  %v600_v9 = vmul.f32 %v1961_v0, %v1961_v0  ;;  %v548_v10 = vadd.f32 %v547_v2, %v546_v58  ;;  %v586_v12 = vrot.slane %v585_v3, 2 }
 0x110   :  { %v597_v13 = vmul.f32 %v583_v5, %v1948_v46  ;;  %v601_v14 = vmul.f32 %v1964_v4, %v1964_v4  ;;  %v554_v16 = vadd.f32 %v553_v6, %v552_v62  ;;  %v592_v17 = vrot.slane %v591_v7, 2 }
 0x111   :  { %v604_v18 = vsub.f32 %v596_v8, %v600_v9  ;;  %v549_v19 = vrot.slane %v548_v10, 1  ;;  %v587_v20 = vadd.f32 %v586_v12, %v585_v3  ;;  %v466_v3 = vld [vmem:[#allocation7 + $0x1e8] sm:$0xff] }
 0x112   :  { %v605_v21 = vsub.f32 %v597_v13, %v601_v14  ;;  %v555_v22 = vrot.slane %v554_v16, 1  ;;  %v593_v23 = vadd.f32 %v592_v17, %v591_v7  ;;  %v461_v13 = vld [vmem:[#allocation7 + $0x1c0] sm:$0xff] }
 0x113   :  { %v608_v24 = vmax.f32 %v604_v18, 0.0  ;;  %v550_v25 = vadd.f32 %v549_v19, %v548_v10  ;;  %v588_v27 = vrot.slane %v587_v20, 1 }
 0x114   :  { %v609_v28 = vmax.f32 %v605_v21, 0.0  ;;  %v556_v29 = vadd.f32 %v555_v22, %v554_v16  ;;  %v594_v30 = vrot.slane %v593_v23, 1  ;;  %v462_v16 = vld [vmem:[#allocation7 + $0x1c8] sm:$0xff]  ;;  %v467_v22 = vld [vmem:[#allocation7 + $0x1f0] sm:$0xff] }
 0x115   :  { %v612_v31 = vadd.f32 1e-05, %v608_v24  ;;  %v1973_v32 = vmul.f32 %v1948_v46, %v550_v25  ;;  %v589_v33 = vadd.f32 %v588_v27, %v587_v20  ;;  %v468_v25 = vld [vmem:[#allocation7 + $0x1f8] sm:$0xff]  ;;  %v458_v27 = vld [vmem:[#allocation7 + $0x1a8] sm:$0xff] }
 0x116   :  { %v613_v34 = vadd.f32 1e-05, %v609_v28  ;;  %v1976_v35 = vmul.f32 %v1948_v46, %v556_v29  ;;  %v595_v36 = vadd.f32 %v594_v30, %v593_v23  ;;  %v457_v23 = vld [vmem:[#allocation7 + $0x1a0] sm:$0xff] }
 0x117   :  { %1637 = vrsqrt.f32 %v612_v31  ;;  %v598_v37 = vmul.f32 %v589_v33, %v1948_v46  ;;  %v602_v38 = vmul.f32 %v1973_v32, %v1973_v32  ;;  %vm622_vm3 = vweird.f32 %v612_v31 }
 0x118   :  { %1639 = vrsqrt.f32 %v613_v34  ;;  %v599_v39 = vmul.f32 %v595_v36, %v1948_v46  ;;  %v603_v40 = vmul.f32 %v1976_v35, %v1976_v35  ;;  %vm632_vm5 = vweird.f32 %v613_v34  ;;  %v463_v36 = vld [vmem:[#allocation7 + $0x1d0] sm:$0xff]  ;;  %v418_v46 = vld [vmem:[#allocation7 + $0x68] sm:$0xff] }
 0x119   :  { %v606_v41 = vsub.f32 %v598_v37, %v602_v38  ;;  %v453_v37 = vld [vmem:[#allocation7 + $0x180] sm:$0xff]  ;;  %v464_v38 = vld [vmem:[#allocation7 + $0x1d8] sm:$0xff] }
 0x11a   :  { %v607_v44 = vsub.f32 %v599_v39, %v603_v40  ;;  %v454_v39 = vld [vmem:[#allocation7 + $0x188] sm:$0xff] }
 0x11b   :  { %v610_v42 = vmax.f32 %v606_v41, 0.0 }
 0x11c   :  { %v611_v43 = vmax.f32 %v607_v44, 0.0 }
 0x11d   :  { %v1638_v47 = vpop.eup %1637  ;;  %v614_v49 = vadd.f32 1e-05, %v610_v42 }
 0x11e   :  { %v1640_v50 = vpop.eup %1639  ;;  %v617_v51 = vmul.f32 %v1638_v47, %v612_v31  ;;  %v615_v52 = vadd.f32 1e-05, %v611_v43  ;;  %vm623_vm1 = vweird.f32 %v1638_v47  ;;  %v459_v43 = vld [vmem:[#allocation7 + $0x1b0] sm:$0xff] }
 0x11f   :  { %v627_v54 = vmul.f32 %v1640_v50, %v613_v34  ;;  %1641 = vrsqrt.f32 %v614_v49  ;;  %vm633_vm2 = vweird.f32 %v1640_v50  ;;  %vm624_vm4 = vmor %vm622_vm3, %vm623_vm1  ;;  %vm642_vm9 = vweird.f32 %v614_v49 }
 0x120   :  { %v618_v55 = vmul.f32 %v1638_v47, %v617_v51  ;;  %1643 = vrsqrt.f32 %v615_v52  ;;  %vm634_vm6 = vmor %vm632_vm5, %vm633_vm2  ;;  %vm652_vm11 = vweird.f32 %v615_v52 }
 0x121   :  { %v628_v56 = vmul.f32 %v1640_v50, %v627_v54 }
 0x122   :  { %v619_v57 = vmul.f32 0.5, %v618_v55 }
 0x123   :  { %v629_v26 = vmul.f32 0.5, %v628_v56  ;;  %v455_v56 = vld [vmem:[#allocation7 + $0x190] sm:$0xff] }
 0x124   :  { %v620_v53 = vsub.f32 1.5, %v619_v57  ;;  %v445_v57 = vld [vmem:[#allocation7 + $0x140] sm:$0xff] }
 0x125   :  { %v1642_v58 = vpop.eup %1641  ;;  %v630_v59 = vsub.f32 1.5, %v629_v26  ;;  %v456_v26 = vld [vmem:[#allocation7 + $0x198] sm:$0xff] }
 0x126   :  { %v1644_v60 = vpop.eup %1643  ;;  %v621_v61 = vmul.f32 %v1638_v47, %v620_v53  ;;  %v637_v62 = vmul.f32 %v1642_v58, %v614_v49  ;;  %vm643_vm7 = vweird.f32 %v1642_v58  ;;  %v460_v49 = vld [vmem:[#allocation7 + $0x1b8] sm:$0xff]  ;;  %v446_v53 = vld [vmem:[#allocation7 + $0x148] sm:$0xff] }
 0x127   :  { %v631_v1 = vmul.f32 %v1640_v50, %v630_v59  ;;  %v647_v2 = vmul.f32 %v1644_v60, %v615_v52  ;;  %vm653_vm8 = vweird.f32 %v1644_v60  ;;  %vm644_vm10 = vmor %vm642_vm9, %vm643_vm7 }
 0x128   :  { %v1984_v5 = vsel %vm624_vm4, %v1638_v47, %v621_v61  ;;  %v638_v6 = vmul.f32 %v1642_v58, %v637_v62  ;;  %vm654_vm12 = vmor %vm652_vm11, %vm653_vm8  ;;  %v449_v47 = vld [vmem:[#allocation7 + $0x160] sm:$0xff]  ;;  %v451_v62 = vld [vmem:[#allocation7 + $0x170] sm:$0xff] }
 0x129   :  { %v1986_v7 = vsel %vm634_vm6, %v1640_v50, %v631_v1  ;;  %v648_v8 = vmul.f32 %v1644_v60, %v647_v2  ;;  %v1989_v9 = vmul.f32 %v1984_v5, %v465_v63  ;;  %v1997_v19 = vmul.f32 %v1984_v5, %v461_v13  ;;  %v450_v50 = vld [vmem:[#allocation7 + $0x168] sm:$0xff]  ;;  %v441_v63 = vld [vmem:[#allocation7 + $0x120] sm:$0xff]  ;;  %v452_v1 = vld [vmem:[#allocation7 + $0x178] sm:$0xff] }
 0x12a   :  { %v639_v10 = vmul.f32 0.5, %v638_v6  ;;  %v1992_v12 = vmul.f32 %v1986_v7, %v466_v3  ;;  %v2000_v21 = vmul.f32 %v1986_v7, %v462_v16  ;;  %v2012_v31 = vmul.f32 %v1984_v5, %v457_v23  ;;  %v442_v2 = vld [vmem:[#allocation7 + $0x128] sm:$0xff]  ;;  %v447_v13 = vld [vmem:[#allocation7 + $0x150] sm:$0xff]  ;;  %v448_v16 = vld [vmem:[#allocation7 + $0x158] sm:$0xff] }
 0x12b   :  { %v649_v14 = vmul.f32 0.5, %v648_v8  ;;  %784 = vmatpush.xpose.msrb.mxu0 %v1989_v9  ;;  %v2018_v34 = vmul.f32 %v1986_v7, %v458_v27  ;;  %v2028_v41 = vmul.f32 %v1984_v5, %v453_v37  ;;  %v2034_v42 = vmul.f32 %v1986_v7, %v454_v39  ;;  %v444_v27 = vld [vmem:[#allocation7 + $0x138] sm:$0xff] }
 0x12c   :  { %v640_v17 = vsub.f32 1.5, %v639_v10  ;;  %804 = vmatpush.xpose.msrb.mxu1 %v1992_v12  ;;  %v2044_v52 = vmul.f32 %v1984_v5, %v449_v47  ;;  %v2050_v55 = vmul.f32 %v1986_v7, %v450_v50  ;;  %v2060_v59 = vmul.f32 %v1984_v5, %v445_v57  ;;  %v439_v47 = vld [vmem:[#allocation7 + $0x110] sm:$0xff]  ;;  %v440_v50 = vld [vmem:[#allocation7 + $0x118] sm:$0xff] }
 0x12d   :  { %v650_v18 = vsub.f32 1.5, %v649_v14  ;;  %v2066_v61 = vmul.f32 %v1986_v7, %v446_v53  ;;  %v2076_v6 = vmul.f32 %v1984_v5, %v441_v63  ;;  %v2082_v10 = vmul.f32 %v1986_v7, %v442_v2  ;;  %v437_v14 = vld [vmem:[#allocation7 + $0x100] sm:$0xff]  ;;  %v435_v63 = vld [vmem:[#allocation7 + $0xf0] sm:$0xff]  ;;  %v436_v2 = vld [vmem:[#allocation7 + $0xf8] sm:$0xff] }
 0x12e   :  { %v641_v20 = vmul.f32 %v1642_v58, %v640_v17  ;;  %v438_v17 = vld [vmem:[#allocation7 + $0x108] sm:$0xff] }
 0x12f   :  { %v651_v24 = vmul.f32 %v1644_v60, %v650_v18  ;;  %785 = vmatpush.xpose.msrb.mxu0 %v1997_v19  ;;  %v2098_v23 = vmul.f32 %v1986_v7, %v438_v17 }
 0x130   :  { %v2003_v28 = vsel %vm644_vm10, %v1642_v58, %v641_v20  ;;  %805 = vmatpush.xpose.msrb.mxu1 %v2000_v21  ;;  %v2092_v20 = vmul.f32 %v1984_v5, %v437_v14 }
 0x131   :  { %v2006_v29 = vsel %vm654_vm12, %v1644_v60, %v651_v24  ;;  %v2009_v30 = vmul.f32 %v2003_v28, %v467_v22  ;;  %v2025_v40 = vmul.f32 %v2003_v28, %v463_v36  ;;  %v2041_v51 = vmul.f32 %v2003_v28, %v459_v43  ;;  %v443_v24 = vld [vmem:[#allocation7 + $0x130] sm:$0xff]  ;;  %v434_v36 = vld [vmem:[#allocation7 + $0xe8] sm:$0xff] }
 0x132   :  { %v2015_v33 = vmul.f32 %v2006_v29, %v468_v25  ;;  %v2031_v44 = vmul.f32 %v2006_v29, %v464_v38  ;;  %v2047_v54 = vmul.f32 %v2006_v29, %v460_v49  ;;  %v2057_v58 = vmul.f32 %v2003_v28, %v455_v56  ;;  %v433_v25 = vld [vmem:[#allocation7 + $0xe0] sm:$0xff]  ;;  %v430_v56 = vld [vmem:[#allocation7 + $0xc8] sm:$0xff] }
 0x133   :  { %824 = vmatpush.xpose.msrb.mxu2 %v2009_v30  ;;  %786 = vmatpush.xpose.msrb.mxu0 %v2012_v31  ;;  %v2063_v60 = vmul.f32 %v2006_v29, %v456_v26  ;;  %v2073_v3 = vmul.f32 %v2003_v28, %v451_v62  ;;  %v2079_v8 = vmul.f32 %v2006_v29, %v452_v1  ;;  %v429_v49 = vld [vmem:[#allocation7 + $0xc0] sm:$0xff] }
 0x134   :  { %844 = vmatpush.xpose.msrb.mxu3 %v2015_v33  ;;  %806 = vmatpush.xpose.msrb.mxu1 %v2018_v34  ;;  %v2089_v18 = vmul.f32 %v2003_v28, %v447_v13  ;;  %v2095_v22 = vmul.f32 %v2006_v29, %v448_v16  ;;  %v2105_v37 = vmul.f32 %v2003_v28, %v443_v24  ;;  %v425_v1 = vld [vmem:[#allocation7 + $0xa0] sm:$0xff]  ;;  %v426_v13 = vld [vmem:[#allocation7 + $0xa8] sm:$0xff] }
 0x135   :  { %v2108_v38 = vmul.f32 %v1984_v5, %v433_v25  ;;  %v2111_v39 = vmul.f32 %v2006_v29, %v444_v27  ;;  %v2114_v43 = vmul.f32 %v1986_v7, %v434_v36  ;;  %v2121_v57 = vmul.f32 %v2003_v28, %v439_v47  ;;  %v431_v25 = vld [vmem:[#allocation7 + $0xd0] sm:$0xff]  ;;  %v421_v27 = vld [vmem:[#allocation7 + $0x80] sm:$0xff]  ;;  %v432_v36 = vld [vmem:[#allocation7 + $0xd8] sm:$0xff] }
 0x136   :  { %v2124_v26 = vmul.f32 %v1984_v5, %v429_v49  ;;  %v2127_v53 = vmul.f32 %v2006_v29, %v440_v50  ;;  %v2130_v62 = vmul.f32 %v1986_v7, %v430_v56  ;;  %v2137_v14 = vmul.f32 %v2003_v28, %v435_v63  ;;  %v422_v47 = vld [vmem:[#allocation7 + $0x88] sm:$0xff] }
 0x137   :  { %825 = vmatpush.xpose.msrb.mxu2 %v2025_v40  ;;  %787 = vmatpush.xpose.msrb.mxu0 %v2028_v41  ;;  %v2140_v16 = vmul.f32 %v1984_v5, %v425_v1  ;;  %v2143_v17 = vmul.f32 %v2006_v29, %v436_v2  ;;  %v2146_v24 = vmul.f32 %v1986_v7, %v426_v13  ;;  %v427_v1 = vld [vmem:[#allocation7 + $0xb0] sm:$0xff]  ;;  %v417_v2 = vld [vmem:[#allocation7 + $0x60] sm:$0xff]  ;;  %v428_v13 = vld [vmem:[#allocation7 + $0xb8] sm:$0xff] }
 0x138   :  { %845 = vmatpush.xpose.msrb.mxu3 %v2031_v44  ;;  %807 = vmatpush.xpose.msrb.mxu1 %v2034_v42  ;;  %v2153_v49 = vmul.f32 %v2003_v28, %v431_v25  ;;  %v2156_v50 = vmul.f32 %v1984_v5, %v421_v27  ;;  %v2159_v56 = vmul.f32 %v2006_v29, %v432_v36 }
 0x139   :  { %v2162_v63 = vmul.f32 %v1986_v7, %v422_v47  ;;  %v2169_v25 = vmul.f32 %v2003_v28, %v427_v1  ;;  %v2172_v27 = vmul.f32 %v1984_v5, %v417_v2  ;;  %v2175_v36 = vmul.f32 %v2006_v29, %v428_v13 }
 0x13a   :  { %v2178_v47 = vmul.f32 %v1986_v7, %v418_v46  ;;  %v2185_v1 = vmul.f32 %v2003_v28, %v423_v48  ;;  %v2188_v2 = vmul.f32 %v1984_v5, %v413_v45  ;;  %v2191_v46 = vmul.f32 %v2006_v29, %v424_v15 }
 0x13b   :  { %826 = vmatpush.xpose.msrb.mxu2 %v2041_v51  ;;  %788 = vmatpush.xpose.msrb.mxu0 %v2044_v52  ;;  %2837 = vst [vmem:[#allocation21_spill] sm:$0xff] %v2162_v63  ;;  %v2194_v13 = vmul.f32 %v1986_v7, %v414_v11 }
 0x13c   :  { %846 = vmatpush.xpose.msrb.mxu3 %v2047_v54  ;;  %808 = vmatpush.xpose.msrb.mxu1 %v2050_v55  ;;  %2838 = vst [vmem:[#allocation22_spill] sm:$0xff] %v2169_v25 }
 0x13d   :  { %2839 = vst [vmem:[#allocation23_spill] sm:$0xff] %v2172_v27 }
 0x13e   :  { %2840 = vst [vmem:[#allocation24_spill] sm:$0xff] %v2175_v36 }
 0x13f   :  { %827 = vmatpush.xpose.msrb.mxu2 %v2057_v58  ;;  %789 = vmatpush.xpose.msrb.mxu0 %v2060_v59  ;;  %2841 = vst [vmem:[#allocation25_spill] sm:$0xff] %v2178_v47 }
 0x140   :  { %847 = vmatpush.xpose.msrb.mxu3 %v2063_v60  ;;  %809 = vmatpush.xpose.msrb.mxu1 %v2066_v61  ;;  %2842 = vst [vmem:[#allocation26_spill] sm:$0xff] %v2185_v1 }
 0x141   :  { %2843 = vst [vmem:[#allocation27_spill] sm:$0xff] %v2188_v2 }
 0x142   :  { %2844 = vst [vmem:[#allocation28_spill] sm:$0xff] %v2191_v46 }
 0x143   :  { %828 = vmatpush.xpose.msrb.mxu2 %v2073_v3  ;;  %790 = vmatpush.xpose.msrb.mxu0 %v2076_v6  ;;  %2845 = vst [vmem:[#allocation29_spill] sm:$0xff] %v2194_v13 }
 0x144   :  { %848 = vmatpush.xpose.msrb.mxu3 %v2079_v8  ;;  %810 = vmatpush.xpose.msrb.mxu1 %v2082_v10 }
 0x147   :  { %829 = vmatpush.xpose.msrb.mxu2 %v2089_v18  ;;  %791 = vmatpush.xpose.msrb.mxu0 %v2092_v20 }
 0x148   :  { %849 = vmatpush.xpose.msrb.mxu3 %v2095_v22  ;;  %811 = vmatpush.xpose.msrb.mxu1 %v2098_v23 }
 0x14b   :  { %830 = vmatpush.xpose.msrb.mxu2 %v2105_v37  ;;  %792 = vmatpush.xpose.msrb.mxu0 %v2108_v38 }
 0x14c   :  { %850 = vmatpush.xpose.msrb.mxu3 %v2111_v39  ;;  %812 = vmatpush.xpose.msrb.mxu1 %v2114_v43 }
 0x14f   :  { %831 = vmatpush.xpose.msrb.mxu2 %v2121_v57  ;;  %793 = vmatpush.xpose.msrb.mxu0 %v2124_v26 }
 0x150   :  { %851 = vmatpush.xpose.msrb.mxu3 %v2127_v53  ;;  %813 = vmatpush.xpose.msrb.mxu1 %v2130_v62 }
 0x153   :  { %832 = vmatpush.xpose.msrb.mxu2 %v2137_v14  ;;  %794 = vmatpush.xpose.msrb.mxu0 %v2140_v16 }
 0x154   :  { %852 = vmatpush.xpose.msrb.mxu3 %v2143_v17  ;;  %814 = vmatpush.xpose.msrb.mxu1 %v2146_v24 }
 0x157   :  { %833 = vmatpush.xpose.msrb.mxu2 %v2153_v49  ;;  %795 = vmatpush.xpose.msrb.mxu0 %v2156_v50 }
 0x158   :  { %853 = vmatpush.xpose.msrb.mxu3 %v2159_v56  ;;  %815 = vmatpush.xpose.msrb.mxu1 %v2162_v63 }
 0x15b   :  { %834 = vmatpush.xpose.msrb.mxu2 %v2169_v25  ;;  %796 = vmatpush.xpose.msrb.mxu0 %v2172_v27  ;;  %v419_v25 = vld [vmem:[#allocation7 + $0x70] sm:$0xff]  ;;  %v409_v27 = vld [vmem:[#allocation7 + $0x20] sm:$0xff] }
 0x15c   :  { %854 = vmatpush.xpose.msrb.mxu3 %v2175_v36  ;;  %816 = vmatpush.xpose.msrb.mxu1 %v2178_v47  ;;  %v420_v36 = vld [vmem:[#allocation7 + $0x78] sm:$0xff]  ;;  %v410_v47 = vld [vmem:[#allocation7 + $0x28] sm:$0xff]  ;;  %v2201_v45 = vmul.f32 %v2003_v28, %v419_v25  ;;  %v2204_v15 = vmul.f32 %v1984_v5, %v409_v27  ;;  %v529_v25 = vld [vmem:[#allocation7 + $0x3e0] sm:$0xff] }
 0x15d   :  { %v2207_v11 = vmul.f32 %v2006_v29, %v420_v36  ;;  %v2210_v48 = vmul.f32 %v1986_v7, %v410_v47  ;;  %v530_v27 = vld [vmem:[#allocation7 + $0x3e8] sm:$0xff] }
 0x15e   :  { %2846 = vst [vmem:[#allocation30_spill] sm:$0xff] %v2201_v45 }
 0x15f   :  { %835 = vmatpush.xpose.msrb.mxu2 %v2185_v1  ;;  %797 = vmatpush.xpose.msrb.mxu0 %v2188_v2  ;;  %2847 = vst [vmem:[#allocation31_spill] sm:$0xff] %v2204_v15  ;;  %v415_v1 = vld [vmem:[#allocation7 + $0x50] sm:$0xff]  ;;  %v405_v2 = vld [vmem:[#allocation7] sm:$0xff] }
 0x160   :  { %855 = vmatpush.xpose.msrb.mxu3 %v2191_v46  ;;  %817 = vmatpush.xpose.msrb.mxu1 %v2194_v13  ;;  %2848 = vst [vmem:[#allocation32_spill] sm:$0xff] %v2207_v11  ;;  %v416_v46 = vld [vmem:[#allocation7 + $0x58] sm:$0xff]  ;;  %v406_v13 = vld [vmem:[#allocation7 + $0x8] sm:$0xff]  ;;  %v2217_v36 = vmul.f32 %v2003_v28, %v415_v1  ;;  %v2220_v47 = vmul.f32 %v1984_v5, %v405_v2  ;;  %v525_v2 = vld [vmem:[#allocation7 + $0x3c0] sm:$0xff] }
 0x161   :  { %2849 = vst [vmem:[#allocation33_spill] sm:$0xff] %v2210_v48  ;;  %v2223_v63 = vmul.f32 %v2006_v29, %v416_v46  ;;  %v2234_v1 = vmul.f32 %v1986_v7, %v530_v27  ;;  %v526_v46 = vld [vmem:[#allocation7 + $0x3c8] sm:$0xff]  ;;  %v407_v27 = vld [vmem:[#allocation7 + $0x10] sm:$0xff] }
 0x162   :  { %2850 = vst [vmem:[#allocation34_spill] sm:$0xff] %v2217_v36 }
 0x163   :  { %836 = vmatpush.xpose.msrb.mxu2 %v2201_v45  ;;  %798 = vmatpush.xpose.msrb.mxu0 %v2204_v15  ;;  %2851 = vst [vmem:[#allocation35_spill] sm:$0xff] %v2220_v47  ;;  %v2226_v45 = vmul.f32 %v1986_v7, %v406_v13  ;;  %v411_v15 = vld [vmem:[#allocation7 + $0x30] sm:$0xff] }
 0x164   :  { %856 = vmatpush.xpose.msrb.mxu3 %v2207_v11  ;;  %818 = vmatpush.xpose.msrb.mxu1 %v2210_v48  ;;  %2852 = vst [vmem:[#allocation36_spill] sm:$0xff] %v2223_v63  ;;  %v2231_v48 = vmul.f32 %v1984_v5, %v529_v25  ;;  %v412_v11 = vld [vmem:[#allocation7 + $0x38] sm:$0xff]  ;;  %v2241_v13 = vmul.f32 %v2003_v28, %v411_v15 }
 0x165   :  { %2853 = vst [vmem:[#allocation37_spill] sm:$0xff] %v2226_v45  ;;  %v2244_v25 = vmul.f32 %v2006_v29, %v412_v11  ;;  %v532_v15 = vld [vmem:[#allocation7 + $0x3f8] sm:$0xff]  ;;  %v521_v11 = vld [vmem:[#allocation7 + $0x3a0] sm:$0xff] }
 0x166   :  { %2854 = vst [vmem:[#allocation38_spill] sm:$0xff] %v2231_v48 }
 0x167   :  { %837 = vmatpush.xpose.msrb.mxu2 %v2217_v36  ;;  %799 = vmatpush.xpose.msrb.mxu0 %v2220_v47  ;;  %2855 = vst [vmem:[#allocation39_spill] sm:$0xff] %v2234_v1  ;;  %v531_v47 = vld [vmem:[#allocation7 + $0x3f0] sm:$0xff]  ;;  %v2272_v36 = vmul.f32 %v1984_v5, %v521_v11 }
 0x168   :  { %857 = vmatpush.xpose.msrb.mxu3 %v2223_v63  ;;  %819 = vmatpush.xpose.msrb.mxu1 %v2226_v45  ;;  %2856 = vst [vmem:[#allocation40_spill] sm:$0xff] %v2241_v13  ;;  %v2250_v45 = vmul.f32 %v1984_v5, %v525_v2  ;;  %v522_v63 = vld [vmem:[#allocation7 + $0x3a8] sm:$0xff] }
 0x169   :  { %2857 = vst [vmem:[#allocation41_spill] sm:$0xff] %v2244_v25 }
 0x16a   :  { %800 = vmatmul.f32.vlgmr.msrb.gmra.mxu0 %v1961_v0  ;;  %2858 = vst [vmem:[#allocation42_spill] sm:$0xff] %v2250_v45 }
 0x16b   :  { %864 = vmatpush.xpose.msra.mxu0 %v2231_v48  ;;  %838 = vmatpush.xpose.msrb.mxu2 %v2241_v13  ;;  %v2253_v48 = vmul.f32 %v1986_v7, %v526_v46  ;;  %v2259_v13 = vmul.f32 %v2003_v28, %v407_v27  ;;  %v2265_v46 = vmul.f32 %v2003_v28, %v531_v47  ;;  %v518_v47 = vld [vmem:[#allocation7 + $0x388] sm:$0xff] }
 0x16c   :  { %884 = vmatpush.xpose.msra.mxu1 %v2234_v1  ;;  %v408_v1 = vld [vmem:[#allocation7 + $0x18] sm:$0xff]  ;;  %858 = vmatpush.xpose.msrb.mxu3 %v2244_v25  ;;  %v2269_v25 = vmul.f32 %v2006_v29, %v532_v15  ;;  %2863 = vst [vmem:[#allocation47_spill] sm:$0xff] %v2272_v36  ;;  %v2277_v27 = vmul.f32 %v1986_v7, %v522_v63 }
 0x16d   :  { %820 = vmatmul.f32.vlgmr.msrb.gmra.mxu1 %v1964_v4  ;;  %2859 = vst [vmem:[#allocation43_spill] sm:$0xff] %v2253_v48  ;;  %v2262_v2 = vmul.f32 %v2006_v29, %v408_v1  ;;  %v528_v1 = vld [vmem:[#allocation7 + $0x3d8] sm:$0xff] }
 0x16e   :  { %2861 = vst [vmem:[#allocation45_spill] sm:$0xff] %v2265_v46  ;;  %v2288_v11 = vmul.f32 %v2006_v29, %v528_v1 }
 0x16f   :  { %865 = vmatpush.xpose.msra.mxu0 %v2250_v45  ;;  %2860 = vst [vmem:[#allocation44_spill] sm:$0xff] %v2262_v2  ;;  %839 = vmatpush.xpose.msrb.mxu2 %v2259_v13  ;;  %v527_v45 = vld [vmem:[#allocation7 + $0x3d0] sm:$0xff] }
 0x170   :  { %885 = vmatpush.xpose.msra.mxu1 %v2253_v48  ;;  %2862 = vst [vmem:[#allocation46_spill] sm:$0xff] %v2269_v25  ;;  %859 = vmatpush.xpose.msrb.mxu3 %v2262_v2  ;;  %v517_v48 = vld [vmem:[#allocation7 + $0x380] sm:$0xff]  ;;  %v2284_v15 = vmul.f32 %v2003_v28, %v527_v45  ;;  %v514_v45 = vld [vmem:[#allocation7 + $0x368] sm:$0xff] }
 0x171   :  { %2864 = vst [vmem:[#allocation48_spill] sm:$0xff] %v2277_v27  ;;  %v2291_v63 = vmul.f32 %v1984_v5, %v517_v48  ;;  %v513_v2 = vld [vmem:[#allocation7 + $0x360] sm:$0xff] }
 0x172   :  { %840 = vmatmul.f32.vlgmr.msrb.gmra.mxu2 %v1973_v32  ;;  %2865 = vst [vmem:[#allocation49_spill] sm:$0xff] %v2284_v15 }
 0x173   :  { %904 = vmatpush.xpose.msra.mxu2 %v2265_v46  ;;  %866 = vmatpush.xpose.msra.mxu0 %v2272_v36  ;;  %2866 = vst [vmem:[#allocation50_spill] sm:$0xff] %v2288_v11  ;;  %v523_v46 = vld [vmem:[#allocation7 + $0x3b0] sm:$0xff]  ;;  %v2295_v36 = vmul.f32 %v1986_v7, %v518_v47 }
 0x174   :  { %924 = vmatpush.xpose.msra.mxu3 %v2269_v25  ;;  %886 = vmatpush.xpose.msra.mxu1 %v2277_v27  ;;  %2867 = vst [vmem:[#allocation51_spill] sm:$0xff] %v2291_v63  ;;  %v524_v25 = vld [vmem:[#allocation7 + $0x3b8] sm:$0xff]  ;;  %v2301_v1 = vmul.f32 %v2003_v28, %v523_v46  ;;  %v519_v47 = vld [vmem:[#allocation7 + $0x390] sm:$0xff]  ;;  %v2311_v27 = vmul.f32 %v1986_v7, %v514_v45  ;;  %v510_v46 = vld [vmem:[#allocation7 + $0x348] sm:$0xff] }
 0x175   :  { %860 = vmatmul.f32.vlgmr.msrb.gmra.mxu3 %v1976_v35  ;;  %2868 = vst [vmem:[#allocation52_spill] sm:$0xff] %v2295_v36  ;;  %v2304_v48 = vmul.f32 %v2006_v29, %v524_v25  ;;  %v2317_v25 = vmul.f32 %v2003_v28, %v519_v47  ;;  %v515_v45 = vld [vmem:[#allocation7 + $0x370] sm:$0xff]  ;;  %v506_v47 = vld [vmem:[#allocation7 + $0x328] sm:$0xff] }
 0x176   :  { %2869 = vst [vmem:[#allocation53_spill] sm:$0xff] %v2301_v1 }
 0x177   :  { %905 = vmatpush.xpose.msra.mxu2 %v2284_v15  ;;  %867 = vmatpush.xpose.msra.mxu0 %v2291_v63  ;;  %2870 = vst [vmem:[#allocation54_spill] sm:$0xff] %v2304_v48  ;;  %v2307_v15 = vmul.f32 %v1984_v5, %v513_v2  ;;  %v509_v63 = vld [vmem:[#allocation7 + $0x340] sm:$0xff] }
 0x178   :  { %925 = vmatpush.xpose.msra.mxu3 %v2288_v11  ;;  %887 = vmatpush.xpose.msra.mxu1 %v2295_v36  ;;  %2872 = vst [vmem:[#allocation56_spill] sm:$0xff] %v2311_v27  ;;  %v520_v11 = vld [vmem:[#allocation7 + $0x398] sm:$0xff]  ;;  %v2327_v36 = vmul.f32 %v1986_v7, %v510_v46  ;;  %v511_v46 = vld [vmem:[#allocation7 + $0x350] sm:$0xff] }
 0x179   :  { %2871 = vst [vmem:[#allocation55_spill] sm:$0xff] %v2307_v15  ;;  %v2320_v2 = vmul.f32 %v2006_v29, %v520_v11  ;;  %v2333_v11 = vmul.f32 %v2003_v28, %v515_v45  ;;  %v502_v45 = vld [vmem:[#allocation7 + $0x308] sm:$0xff] }
 0x17a   :  { %2873 = vst [vmem:[#allocation57_spill] sm:$0xff] %v2317_v25 }
 0x17b   :  { %906 = vmatpush.xpose.msra.mxu2 %v2301_v1  ;;  %868 = vmatpush.xpose.msra.mxu0 %v2307_v15  ;;  %2874 = vst [vmem:[#allocation58_spill] sm:$0xff] %v2320_v2  ;;  %v2323_v1 = vmul.f32 %v1984_v5, %v509_v63  ;;  %v505_v15 = vld [vmem:[#allocation7 + $0x320] sm:$0xff] }
 0x17c   :  { %926 = vmatpush.xpose.msra.mxu3 %v2304_v48  ;;  %888 = vmatpush.xpose.msra.mxu1 %v2311_v27  ;;  %2876 = vst [vmem:[#allocation60_spill] sm:$0xff] %v2327_v36  ;;  %v516_v48 = vld [vmem:[#allocation7 + $0x378] sm:$0xff]  ;;  %v2343_v27 = vmul.f32 %v1986_v7, %v506_v47  ;;  %v507_v47 = vld [vmem:[#allocation7 + $0x330] sm:$0xff] }
 0x17d   :  { %2875 = vst [vmem:[#allocation59_spill] sm:$0xff] %v2323_v1  ;;  %v2336_v63 = vmul.f32 %v2006_v29, %v516_v48  ;;  %v2349_v48 = vmul.f32 %v2003_v28, %v511_v46  ;;  %v498_v46 = vld [vmem:[#allocation7 + $0x2e8] sm:$0xff] }
 0x17e   :  { %2877 = vst [vmem:[#allocation61_spill] sm:$0xff] %v2333_v11 }
 0x17f   :  { %907 = vmatpush.xpose.msra.mxu2 %v2317_v25  ;;  %869 = vmatpush.xpose.msra.mxu0 %v2323_v1  ;;  %2878 = vst [vmem:[#allocation62_spill] sm:$0xff] %v2336_v63  ;;  %v2339_v25 = vmul.f32 %v1984_v5, %v505_v15  ;;  %v501_v1 = vld [vmem:[#allocation7 + $0x300] sm:$0xff] }
 0x180   :  { %927 = vmatpush.xpose.msra.mxu3 %v2320_v2  ;;  %889 = vmatpush.xpose.msra.mxu1 %v2327_v36  ;;  %2880 = vst [vmem:[#allocation64_spill] sm:$0xff] %v2343_v27  ;;  %v512_v2 = vld [vmem:[#allocation7 + $0x358] sm:$0xff]  ;;  %v2359_v36 = vmul.f32 %v1986_v7, %v502_v45  ;;  %v503_v45 = vld [vmem:[#allocation7 + $0x310] sm:$0xff] }
 0x181   :  { %2879 = vst [vmem:[#allocation63_spill] sm:$0xff] %v2339_v25  ;;  %v2352_v15 = vmul.f32 %v2006_v29, %v512_v2  ;;  %v2365_v2 = vmul.f32 %v2003_v28, %v507_v47  ;;  %v494_v47 = vld [vmem:[#allocation7 + $0x2c8] sm:$0xff] }
 0x182   :  { %2881 = vst [vmem:[#allocation65_spill] sm:$0xff] %v2349_v48 }
 0x183   :  { %908 = vmatpush.xpose.msra.mxu2 %v2333_v11  ;;  %870 = vmatpush.xpose.msra.mxu0 %v2339_v25  ;;  %2882 = vst [vmem:[#allocation66_spill] sm:$0xff] %v2352_v15  ;;  %v2355_v11 = vmul.f32 %v1984_v5, %v501_v1  ;;  %v497_v25 = vld [vmem:[#allocation7 + $0x2e0] sm:$0xff] }
 0x184   :  { %928 = vmatpush.xpose.msra.mxu3 %v2336_v63  ;;  %890 = vmatpush.xpose.msra.mxu1 %v2343_v27  ;;  %2884 = vst [vmem:[#allocation68_spill] sm:$0xff] %v2359_v36  ;;  %v508_v63 = vld [vmem:[#allocation7 + $0x338] sm:$0xff]  ;;  %v2375_v27 = vmul.f32 %v1986_v7, %v498_v46  ;;  %v499_v46 = vld [vmem:[#allocation7 + $0x2f0] sm:$0xff] }
 0x185   :  { %2883 = vst [vmem:[#allocation67_spill] sm:$0xff] %v2355_v11  ;;  %v2368_v1 = vmul.f32 %v2006_v29, %v508_v63  ;;  %v2381_v63 = vmul.f32 %v2003_v28, %v503_v45  ;;  %v490_v45 = vld [vmem:[#allocation7 + $0x2a8] sm:$0xff] }
 0x186   :  { %2885 = vst [vmem:[#allocation69_spill] sm:$0xff] %v2365_v2 }
 0x187   :  { %909 = vmatpush.xpose.msra.mxu2 %v2349_v48  ;;  %871 = vmatpush.xpose.msra.mxu0 %v2355_v11  ;;  %2886 = vst [vmem:[#allocation70_spill] sm:$0xff] %v2368_v1  ;;  %v2371_v48 = vmul.f32 %v1984_v5, %v497_v25  ;;  %v493_v11 = vld [vmem:[#allocation7 + $0x2c0] sm:$0xff] }
 0x188   :  { %929 = vmatpush.xpose.msra.mxu3 %v2352_v15  ;;  %891 = vmatpush.xpose.msra.mxu1 %v2359_v36  ;;  %2888 = vst [vmem:[#allocation72_spill] sm:$0xff] %v2375_v27  ;;  %v504_v15 = vld [vmem:[#allocation7 + $0x318] sm:$0xff]  ;;  %v2391_v36 = vmul.f32 %v1986_v7, %v494_v47  ;;  %v495_v47 = vld [vmem:[#allocation7 + $0x2d0] sm:$0xff] }
 0x189   :  { %2887 = vst [vmem:[#allocation71_spill] sm:$0xff] %v2371_v48  ;;  %v2384_v25 = vmul.f32 %v2006_v29, %v504_v15  ;;  %v2397_v15 = vmul.f32 %v2003_v28, %v499_v46  ;;  %v486_v46 = vld [vmem:[#allocation7 + $0x288] sm:$0xff] }
 0x18a   :  { %2889 = vst [vmem:[#allocation73_spill] sm:$0xff] %v2381_v63 }
 0x18b   :  { %910 = vmatpush.xpose.msra.mxu2 %v2365_v2  ;;  %872 = vmatpush.xpose.msra.mxu0 %v2371_v48  ;;  %2890 = vst [vmem:[#allocation74_spill] sm:$0xff] %v2384_v25  ;;  %v2387_v2 = vmul.f32 %v1984_v5, %v493_v11  ;;  %v489_v48 = vld [vmem:[#allocation7 + $0x2a0] sm:$0xff] }
 0x18c   :  { %930 = vmatpush.xpose.msra.mxu3 %v2368_v1  ;;  %892 = vmatpush.xpose.msra.mxu1 %v2375_v27  ;;  %2892 = vst [vmem:[#allocation76_spill] sm:$0xff] %v2391_v36  ;;  %v500_v1 = vld [vmem:[#allocation7 + $0x2f8] sm:$0xff]  ;;  %v2407_v27 = vmul.f32 %v1986_v7, %v490_v45  ;;  %v491_v45 = vld [vmem:[#allocation7 + $0x2b0] sm:$0xff] }
 0x18d   :  { %2891 = vst [vmem:[#allocation75_spill] sm:$0xff] %v2387_v2  ;;  %v2400_v11 = vmul.f32 %v2006_v29, %v500_v1  ;;  %v2413_v1 = vmul.f32 %v2003_v28, %v495_v47  ;;  %v482_v47 = vld [vmem:[#allocation7 + $0x268] sm:$0xff] }
 0x18e   :  { %2893 = vst [vmem:[#allocation77_spill] sm:$0xff] %v2397_v15 }
 0x18f   :  { %911 = vmatpush.xpose.msra.mxu2 %v2381_v63  ;;  %873 = vmatpush.xpose.msra.mxu0 %v2387_v2  ;;  %2894 = vst [vmem:[#allocation78_spill] sm:$0xff] %v2400_v11  ;;  %v2403_v63 = vmul.f32 %v1984_v5, %v489_v48  ;;  %v485_v2 = vld [vmem:[#allocation7 + $0x280] sm:$0xff] }
 0x190   :  { %931 = vmatpush.xpose.msra.mxu3 %v2384_v25  ;;  %893 = vmatpush.xpose.msra.mxu1 %v2391_v36  ;;  %2896 = vst [vmem:[#allocation80_spill] sm:$0xff] %v2407_v27  ;;  %v496_v25 = vld [vmem:[#allocation7 + $0x2d8] sm:$0xff]  ;;  %v2423_v36 = vmul.f32 %v1986_v7, %v486_v46  ;;  %v487_v46 = vld [vmem:[#allocation7 + $0x290] sm:$0xff] }
 0x191   :  { %2895 = vst [vmem:[#allocation79_spill] sm:$0xff] %v2403_v63  ;;  %v2416_v48 = vmul.f32 %v2006_v29, %v496_v25  ;;  %v2429_v25 = vmul.f32 %v2003_v28, %v491_v45  ;;  %v478_v45 = vld [vmem:[#allocation7 + $0x248] sm:$0xff] }
 0x192   :  { %2897 = vst [vmem:[#allocation81_spill] sm:$0xff] %v2413_v1 }
 0x193   :  { %912 = vmatpush.xpose.msra.mxu2 %v2397_v15  ;;  %874 = vmatpush.xpose.msra.mxu0 %v2403_v63  ;;  %2898 = vst [vmem:[#allocation82_spill] sm:$0xff] %v2416_v48  ;;  %v2419_v15 = vmul.f32 %v1984_v5, %v485_v2  ;;  %v481_v63 = vld [vmem:[#allocation7 + $0x260] sm:$0xff] }
 0x194   :  { %932 = vmatpush.xpose.msra.mxu3 %v2400_v11  ;;  %894 = vmatpush.xpose.msra.mxu1 %v2407_v27  ;;  %2900 = vst [vmem:[#allocation84_spill] sm:$0xff] %v2423_v36  ;;  %v492_v11 = vld [vmem:[#allocation7 + $0x2b8] sm:$0xff]  ;;  %v2439_v27 = vmul.f32 %v1986_v7, %v482_v47  ;;  %v483_v47 = vld [vmem:[#allocation7 + $0x270] sm:$0xff] }
 0x195   :  { %2899 = vst [vmem:[#allocation83_spill] sm:$0xff] %v2419_v15  ;;  %v2432_v2 = vmul.f32 %v2006_v29, %v492_v11  ;;  %v2445_v11 = vmul.f32 %v2003_v28, %v487_v46  ;;  %v474_v46 = vld [vmem:[#allocation7 + $0x228] sm:$0xff] }
 0x196   :  { %2901 = vst [vmem:[#allocation85_spill] sm:$0xff] %v2429_v25 }
 0x197   :  { %913 = vmatpush.xpose.msra.mxu2 %v2413_v1  ;;  %875 = vmatpush.xpose.msra.mxu0 %v2419_v15  ;;  %2902 = vst [vmem:[#allocation86_spill] sm:$0xff] %v2432_v2  ;;  %v2435_v1 = vmul.f32 %v1984_v5, %v481_v63  ;;  %v477_v15 = vld [vmem:[#allocation7 + $0x240] sm:$0xff] }
 0x198   :  { %933 = vmatpush.xpose.msra.mxu3 %v2416_v48  ;;  %895 = vmatpush.xpose.msra.mxu1 %v2423_v36  ;;  %2904 = vst [vmem:[#allocation88_spill] sm:$0xff] %v2439_v27  ;;  %v488_v48 = vld [vmem:[#allocation7 + $0x298] sm:$0xff]  ;;  %v2455_v36 = vmul.f32 %v1986_v7, %v478_v45  ;;  %v479_v45 = vld [vmem:[#allocation7 + $0x250] sm:$0xff] }
 0x199   :  { %2903 = vst [vmem:[#allocation87_spill] sm:$0xff] %v2435_v1  ;;  %v2448_v63 = vmul.f32 %v2006_v29, %v488_v48  ;;  %v2461_v48 = vmul.f32 %v2003_v28, %v483_v47  ;;  %v470_v47 = vld [vmem:[#allocation7 + $0x208] sm:$0xff] }
 0x19a   :  { %2905 = vst [vmem:[#allocation89_spill] sm:$0xff] %v2445_v11 }
 0x19b   :  { %914 = vmatpush.xpose.msra.mxu2 %v2429_v25  ;;  %876 = vmatpush.xpose.msra.mxu0 %v2435_v1  ;;  %2906 = vst [vmem:[#allocation90_spill] sm:$0xff] %v2448_v63  ;;  %v2451_v25 = vmul.f32 %v1984_v5, %v477_v15  ;;  %v473_v1 = vld [vmem:[#allocation7 + $0x220] sm:$0xff] }
 0x19c   :  { %934 = vmatpush.xpose.msra.mxu3 %v2432_v2  ;;  %896 = vmatpush.xpose.msra.mxu1 %v2439_v27  ;;  %2908 = vst [vmem:[#allocation92_spill] sm:$0xff] %v2455_v36  ;;  %v484_v2 = vld [vmem:[#allocation7 + $0x278] sm:$0xff]  ;;  %v2471_v27 = vmul.f32 %v1986_v7, %v474_v46  ;;  %v475_v46 = vld [vmem:[#allocation7 + $0x230] sm:$0xff] }
 0x19d   :  { %2907 = vst [vmem:[#allocation91_spill] sm:$0xff] %v2451_v25  ;;  %v2464_v15 = vmul.f32 %v2006_v29, %v484_v2  ;;  %v2477_v2 = vmul.f32 %v2003_v28, %v479_v45  ;;  %v2960_v45 = vld [vmem:[#allocation66_spill] sm:$0xff] }
 0x19e   :  { %2909 = vst [vmem:[#allocation93_spill] sm:$0xff] %v2461_v48 }
 0x19f   :  { %915 = vmatpush.xpose.msra.mxu2 %v2445_v11  ;;  %877 = vmatpush.xpose.msra.mxu0 %v2451_v25  ;;  %2910 = vst [vmem:[#allocation94_spill] sm:$0xff] %v2464_v15  ;;  %v2467_v11 = vmul.f32 %v1984_v5, %v473_v1  ;;  %v469_v25 = vld [vmem:[#allocation7 + $0x200] sm:$0xff] }
 0x1a0   :  { %935 = vmatpush.xpose.msra.mxu3 %v2448_v63  ;;  %897 = vmatpush.xpose.msra.mxu1 %v2455_v36  ;;  %v480_v63 = vld [vmem:[#allocation7 + $0x258] sm:$0xff]  ;;  %v2487_v36 = vmul.f32 %v1986_v7, %v470_v47  ;;  %v2961_v47 = vld [vmem:[#allocation67_spill] sm:$0xff] }
 0x1a1   :  { %v2480_v1 = vmul.f32 %v2006_v29, %v480_v63  ;;  %v2494_v63 = vmul.f32 %v2003_v28, %v475_v46  ;;  %v472_v7 = vld [vmem:[#allocation7 + $0x218] sm:$0xff]  ;;  %v2962_v46 = vld [vmem:[#allocation68_spill] sm:$0xff] }
 0x1a3   :  { %916 = vmatpush.xpose.msra.mxu2 %v2461_v48  ;;  %878 = vmatpush.xpose.msra.mxu0 %v2467_v11  ;;  %v2483_v48 = vmul.f32 %v1984_v5, %v469_v25  ;;  %v471_v25 = vld [vmem:[#allocation7 + $0x210] sm:$0xff] }
 0x1a4   :  { %936 = vmatpush.xpose.msra.mxu3 %v2464_v15  ;;  %898 = vmatpush.xpose.msra.mxu1 %v2471_v27  ;;  %v476_v15 = vld [vmem:[#allocation7 + $0x238] sm:$0xff] }
 0x1a5   :  { %v2498_v5 = vmul.f32 %v2006_v29, %v476_v15  ;;  %v2959_v15 = vld [vmem:[#allocation65_spill] sm:$0xff] }
 0x1a7   :  { %917 = vmatpush.xpose.msra.mxu2 %v2477_v2  ;;  %879 = vmatpush.xpose.msra.mxu0 %v2483_v48 }
 0x1a8   :  { %937 = vmatpush.xpose.msra.mxu3 %v2480_v1  ;;  %899 = vmatpush.xpose.msra.mxu1 %v2487_v36 }
 0x1aa   :  { %880 = vmatmul.f32.vlgmr.msra.gmra.mxu0 %v1961_v0  ;;  %v2911_v0 = vld [vmem:[#allocation21_spill] sm:$0xff] }
 0x1ab   :  { %956 = vmatpush.xpose.msrb.mxu0 %v1989_v9  ;;  %918 = vmatpush.xpose.msra.mxu2 %v2494_v63  ;;  %v2506_v9 = vmul.f32 %v2003_v28, %v471_v25  ;;  %v2917_v28 = vld [vmem:[#allocation28_spill] sm:$0xff]  ;;  %v2963_v25 = vld [vmem:[#allocation69_spill] sm:$0xff] }
 0x1ac   :  { %976 = vmatpush.xpose.msrb.mxu1 %v1992_v12  ;;  %938 = vmatpush.xpose.msra.mxu3 %v2498_v5  ;;  %v2510_v12 = vmul.f32 %v2006_v29, %v472_v7  ;;  %v2918_v29 = vld [vmem:[#allocation27_spill] sm:$0xff]  ;;  %v2964_v7 = vld [vmem:[#allocation70_spill] sm:$0xff] }
 0x1ad   :  { %900 = vmatmul.f32.vlgmr.msra.gmra.mxu1 %v1964_v4  ;;  %v2912_v4 = vld [vmem:[#allocation22_spill] sm:$0xff] }
 0x1af   :  { %957 = vmatpush.xpose.msrb.mxu0 %v1997_v19  ;;  %919 = vmatpush.xpose.msra.mxu2 %v2506_v9  ;;  %v2915_v19 = vld [vmem:[#allocation25_spill] sm:$0xff] }
 0x1b0   :  { %977 = vmatpush.xpose.msrb.mxu1 %v2000_v21  ;;  %939 = vmatpush.xpose.msra.mxu3 %v2510_v12  ;;  %v2916_v21 = vld [vmem:[#allocation26_spill] sm:$0xff] }
 0x1b2   :  { %920 = vmatmul.f32.vlgmr.msra.gmra.mxu2 %v1973_v32  ;;  %v2913_v32 = vld [vmem:[#allocation24_spill] sm:$0xff] }
 0x1b3   :  { %996 = vmatpush.xpose.msrb.mxu2 %v2009_v30  ;;  %958 = vmatpush.xpose.msrb.mxu0 %v2012_v31  ;;  %v2919_v30 = vld [vmem:[#allocation29_spill] sm:$0xff]  ;;  %v2920_v31 = vld [vmem:[#allocation30_spill] sm:$0xff] }
 0x1b4   :  { %1016 = vmatpush.xpose.msrb.mxu3 %v2015_v33  ;;  %978 = vmatpush.xpose.msrb.mxu1 %v2018_v34  ;;  %v2921_v33 = vld [vmem:[#allocation32_spill] sm:$0xff]  ;;  %v2922_v34 = vld [vmem:[#allocation31_spill] sm:$0xff] }
 0x1b5   :  { %940 = vmatmul.f32.vlgmr.msra.gmra.mxu3 %v1976_v35  ;;  %v2914_v35 = vld [vmem:[#allocation23_spill] sm:$0xff] }
 0x1b7   :  { %997 = vmatpush.xpose.msrb.mxu2 %v2025_v40  ;;  %959 = vmatpush.xpose.msrb.mxu0 %v2028_v41  ;;  %v2923_v40 = vld [vmem:[#allocation33_spill] sm:$0xff]  ;;  %v2924_v41 = vld [vmem:[#allocation34_spill] sm:$0xff] }
 0x1b8   :  { %1017 = vmatpush.xpose.msrb.mxu3 %v2031_v44  ;;  %979 = vmatpush.xpose.msrb.mxu1 %v2034_v42  ;;  %v2925_v44 = vld [vmem:[#allocation36_spill] sm:$0xff]  ;;  %v2926_v42 = vld [vmem:[#allocation35_spill] sm:$0xff] }
 0x1bb   :  { %998 = vmatpush.xpose.msrb.mxu2 %v2041_v51  ;;  %960 = vmatpush.xpose.msrb.mxu0 %v2044_v52  ;;  %v2927_v51 = vld [vmem:[#allocation37_spill] sm:$0xff]  ;;  %v2928_v52 = vld [vmem:[#allocation38_spill] sm:$0xff] }
 0x1bc   :  { %1018 = vmatpush.xpose.msrb.mxu3 %v2047_v54  ;;  %980 = vmatpush.xpose.msrb.mxu1 %v2050_v55  ;;  %v2929_v54 = vld [vmem:[#allocation39_spill] sm:$0xff]  ;;  %v2930_v55 = vld [vmem:[#allocation40_spill] sm:$0xff] }
 0x1bf   :  { %999 = vmatpush.xpose.msrb.mxu2 %v2057_v58  ;;  %961 = vmatpush.xpose.msrb.mxu0 %v2060_v59  ;;  %v2931_v58 = vld [vmem:[#allocation16_spill] sm:$0xff]  ;;  %v2932_v59 = vld [vmem:[#allocation41_spill] sm:$0xff] }
 0x1c0   :  { %1019 = vmatpush.xpose.msrb.mxu3 %v2063_v60  ;;  %981 = vmatpush.xpose.msrb.mxu1 %v2066_v61  ;;  %v2933_v60 = vld [vmem:[#allocation17_spill] sm:$0xff]  ;;  %v2934_v61 = vld [vmem:[#allocation42_spill] sm:$0xff] }
 0x1c3   :  { %1000 = vmatpush.xpose.msrb.mxu2 %v2073_v3  ;;  %962 = vmatpush.xpose.msrb.mxu0 %v2076_v6  ;;  %v2935_v3 = vld [vmem:[#allocation43_spill] sm:$0xff]  ;;  %v2936_v6 = vld [vmem:[#allocation44_spill] sm:$0xff] }
 0x1c4   :  { %1020 = vmatpush.xpose.msrb.mxu3 %v2079_v8  ;;  %982 = vmatpush.xpose.msrb.mxu1 %v2082_v10  ;;  %v2937_v8 = vld [vmem:[#allocation45_spill] sm:$0xff]  ;;  %v2938_v10 = vld [vmem:[#allocation46_spill] sm:$0xff] }
 0x1c7   :  { %1001 = vmatpush.xpose.msrb.mxu2 %v2089_v18  ;;  %963 = vmatpush.xpose.msrb.mxu0 %v2092_v20  ;;  %v2939_v18 = vld [vmem:[#allocation47_spill] sm:$0xff]  ;;  %v2940_v20 = vld [vmem:[#allocation18_spill] sm:$0xff] }
 0x1c8   :  { %1021 = vmatpush.xpose.msrb.mxu3 %v2095_v22  ;;  %983 = vmatpush.xpose.msrb.mxu1 %v2098_v23  ;;  %v2941_v22 = vld [vmem:[#allocation48_spill] sm:$0xff] }
 0x1c9   :  { %v2942_v23 = vld [vmem:[#allocation20_spill] sm:$0xff] }
 0x1cb   :  { %1002 = vmatpush.xpose.msrb.mxu2 %v2105_v37  ;;  %964 = vmatpush.xpose.msrb.mxu0 %v2108_v38  ;;  %v2943_v37 = vld [vmem:[#allocation49_spill] sm:$0xff]  ;;  %v2944_v38 = vld [vmem:[#allocation50_spill] sm:$0xff] }
 0x1cc   :  { %1022 = vmatpush.xpose.msrb.mxu3 %v2111_v39  ;;  %984 = vmatpush.xpose.msrb.mxu1 %v2114_v43  ;;  %v2945_v39 = vld [vmem:[#allocation51_spill] sm:$0xff]  ;;  %v2946_v43 = vld [vmem:[#allocation52_spill] sm:$0xff] }
 0x1cf   :  { %1003 = vmatpush.xpose.msrb.mxu2 %v2121_v57  ;;  %965 = vmatpush.xpose.msrb.mxu0 %v2124_v26  ;;  %v2947_v57 = vld [vmem:[#allocation53_spill] sm:$0xff]  ;;  %v2948_v26 = vld [vmem:[#allocation54_spill] sm:$0xff] }
 0x1d0   :  { %1023 = vmatpush.xpose.msrb.mxu3 %v2127_v53  ;;  %985 = vmatpush.xpose.msrb.mxu1 %v2130_v62  ;;  %v2949_v53 = vld [vmem:[#allocation55_spill] sm:$0xff]  ;;  %v2950_v62 = vld [vmem:[#allocation56_spill] sm:$0xff] }
 0x1d3   :  { %1004 = vmatpush.xpose.msrb.mxu2 %v2137_v14  ;;  %966 = vmatpush.xpose.msrb.mxu0 %v2140_v16  ;;  %v2951_v14 = vld [vmem:[#allocation57_spill] sm:$0xff]  ;;  %v2952_v16 = vld [vmem:[#allocation58_spill] sm:$0xff] }
 0x1d4   :  { %1024 = vmatpush.xpose.msrb.mxu3 %v2143_v17  ;;  %986 = vmatpush.xpose.msrb.mxu1 %v2146_v24  ;;  %v2953_v17 = vld [vmem:[#allocation59_spill] sm:$0xff]  ;;  %v2954_v24 = vld [vmem:[#allocation60_spill] sm:$0xff] }
 0x1d7   :  { %1005 = vmatpush.xpose.msrb.mxu2 %v2153_v49  ;;  %967 = vmatpush.xpose.msrb.mxu0 %v2156_v50  ;;  %v2955_v49 = vld [vmem:[#allocation61_spill] sm:$0xff]  ;;  %v2956_v50 = vld [vmem:[#allocation62_spill] sm:$0xff] }
 0x1d8   :  { %1025 = vmatpush.xpose.msrb.mxu3 %v2159_v56  ;;  %987 = vmatpush.xpose.msrb.mxu1 %v2911_v0  ;;  %v2957_v56 = vld [vmem:[#allocation63_spill] sm:$0xff] }
 0x1d9   :  { %v2965_v0 = vld [vmem:[#allocation71_spill] sm:$0xff] }
 0x1db   :  { %1006 = vmatpush.xpose.msrb.mxu2 %v2912_v4  ;;  %968 = vmatpush.xpose.msrb.mxu0 %v2914_v35  ;;  %v2966_v4 = vld [vmem:[#allocation72_spill] sm:$0xff]  ;;  %v2968_v35 = vld [vmem:[#allocation74_spill] sm:$0xff] }
 0x1dc   :  { %1026 = vmatpush.xpose.msrb.mxu3 %v2913_v32  ;;  %988 = vmatpush.xpose.msrb.mxu1 %v2915_v19  ;;  %v2967_v32 = vld [vmem:[#allocation73_spill] sm:$0xff]  ;;  %v2969_v19 = vld [vmem:[#allocation75_spill] sm:$0xff] }
 0x1df   :  { %1007 = vmatpush.xpose.msrb.mxu2 %v2916_v21  ;;  %969 = vmatpush.xpose.msrb.mxu0 %v2918_v29  ;;  %v2970_v21 = vld [vmem:[#allocation76_spill] sm:$0xff]  ;;  %v2972_v29 = vld [vmem:[#allocation78_spill] sm:$0xff] }
 0x1e0   :  { %1027 = vmatpush.xpose.msrb.mxu3 %v2917_v28  ;;  %989 = vmatpush.xpose.msrb.mxu1 %v2919_v30  ;;  %v2971_v28 = vld [vmem:[#allocation77_spill] sm:$0xff]  ;;  %v2973_v30 = vld [vmem:[#allocation79_spill] sm:$0xff] }
 0x1e3   :  { %1008 = vmatpush.xpose.msrb.mxu2 %v2920_v31  ;;  %970 = vmatpush.xpose.msrb.mxu0 %v2922_v34  ;;  %v2974_v31 = vld [vmem:[#allocation80_spill] sm:$0xff]  ;;  %v2976_v34 = vld [vmem:[#allocation82_spill] sm:$0xff] }
 0x1e4   :  { %1028 = vmatpush.xpose.msrb.mxu3 %v2921_v33  ;;  %990 = vmatpush.xpose.msrb.mxu1 %v2923_v40  ;;  %v2975_v33 = vld [vmem:[#allocation81_spill] sm:$0xff]  ;;  %v2977_v40 = vld [vmem:[#allocation83_spill] sm:$0xff] }
 0x1e7   :  { %1009 = vmatpush.xpose.msrb.mxu2 %v2924_v41  ;;  %971 = vmatpush.xpose.msrb.mxu0 %v2926_v42  ;;  %v2978_v41 = vld [vmem:[#allocation84_spill] sm:$0xff]  ;;  %v2980_v42 = vld [vmem:[#allocation86_spill] sm:$0xff] }
 0x1e8   :  { %1029 = vmatpush.xpose.msrb.mxu3 %v2925_v44  ;;  %991 = vmatpush.xpose.msrb.mxu1 %v2927_v51  ;;  %v2979_v44 = vld [vmem:[#allocation85_spill] sm:$0xff]  ;;  %v2981_v51 = vld [vmem:[#allocation87_spill] sm:$0xff] }
 0x1ea   :  { %972 = vmatmul.f32.vlgmr.msrb.gmra.mxu0 %v2931_v58 }
 0x1eb   :  { %1036 = vmatpush.xpose.msra.mxu0 %v2928_v52  ;;  %1010 = vmatpush.xpose.msrb.mxu2 %v2930_v55  ;;  %v2982_v52 = vld [vmem:[#allocation88_spill] sm:$0xff]  ;;  %v2984_v55 = vld [vmem:[#allocation90_spill] sm:$0xff] }
 0x1ec   :  { %1056 = vmatpush.xpose.msra.mxu1 %v2929_v54  ;;  %1030 = vmatpush.xpose.msrb.mxu3 %v2932_v59  ;;  %v2983_v54 = vld [vmem:[#allocation89_spill] sm:$0xff]  ;;  %v2985_v59 = vld [vmem:[#allocation91_spill] sm:$0xff] }
 0x1ed   :  { %992 = vmatmul.f32.vlgmr.msrb.gmra.mxu1 %v2933_v60 }
 0x1ef   :  { %1037 = vmatpush.xpose.msra.mxu0 %v2934_v61  ;;  %1011 = vmatpush.xpose.msrb.mxu2 %v2259_v13  ;;  %v2958_v13 = vld [vmem:[#allocation64_spill] sm:$0xff] }
 0x1f0   :  { %1057 = vmatpush.xpose.msra.mxu1 %v2935_v3  ;;  %1031 = vmatpush.xpose.msrb.mxu3 %v2936_v6  ;;  %v2986_v61 = vld [vmem:[#allocation92_spill] sm:$0xff]  ;;  %v2987_v3 = vld [vmem:[#allocation93_spill] sm:$0xff]  ;;  %v2988_v6 = vld [vmem:[#allocation94_spill] sm:$0xff] }
 0x1f2   :  { %1012 = vmatmul.f32.vlgmr.msrb.gmra.mxu2 %v2940_v20 }
 0x1f3   :  { %1076 = vmatpush.xpose.msra.mxu2 %v2937_v8  ;;  %1038 = vmatpush.xpose.msra.mxu0 %v2939_v18 }
 0x1f4   :  { %1096 = vmatpush.xpose.msra.mxu3 %v2938_v10  ;;  %1058 = vmatpush.xpose.msra.mxu1 %v2941_v22  ;;  %v111_v22 = vld [vmem:[#allocation10 + $0x4] sm:$0x3] }
 0x1f5   :  { %1032 = vmatmul.f32.vlgmr.msrb.gmra.mxu3 %v2942_v23 }
 0x1f7   :  { %1077 = vmatpush.xpose.msra.mxu2 %v2943_v37  ;;  %1039 = vmatpush.xpose.msra.mxu0 %v2945_v39 }
 0x1f8   :  { %1097 = vmatpush.xpose.msra.mxu3 %v2944_v38  ;;  %1059 = vmatpush.xpose.msra.mxu1 %v2946_v43 }
 0x1fb   :  { %1078 = vmatpush.xpose.msra.mxu2 %v2947_v57  ;;  %1040 = vmatpush.xpose.msra.mxu0 %v2949_v53 }
 0x1fc   :  { %1098 = vmatpush.xpose.msra.mxu3 %v2948_v26  ;;  %1060 = vmatpush.xpose.msra.mxu1 %v2950_v62 }
 0x1ff   :  { %1079 = vmatpush.xpose.msra.mxu2 %v2951_v14  ;;  %1041 = vmatpush.xpose.msra.mxu0 %v2953_v17 }
 0x200   :  { %1099 = vmatpush.xpose.msra.mxu3 %v2952_v16  ;;  %1061 = vmatpush.xpose.msra.mxu1 %v2954_v24 }
 0x203   :  { %1080 = vmatpush.xpose.msra.mxu2 %v2955_v49  ;;  %1042 = vmatpush.xpose.msra.mxu0 %v2957_v56 }
 0x204   :  { %1100 = vmatpush.xpose.msra.mxu3 %v2956_v50  ;;  %1062 = vmatpush.xpose.msra.mxu1 %v2958_v13 }
 0x207   :  { %1081 = vmatpush.xpose.msra.mxu2 %v2959_v15  ;;  %1043 = vmatpush.xpose.msra.mxu0 %v2961_v47 }
 0x208   :  { %1101 = vmatpush.xpose.msra.mxu3 %v2960_v45  ;;  %1063 = vmatpush.xpose.msra.mxu1 %v2962_v46 }
 0x20b   :  { %1082 = vmatpush.xpose.msra.mxu2 %v2963_v25  ;;  %1044 = vmatpush.xpose.msra.mxu0 %v2965_v0 }
 0x20c   :  { %1102 = vmatpush.xpose.msra.mxu3 %v2964_v7  ;;  %1064 = vmatpush.xpose.msra.mxu1 %v2966_v4 }
 0x20f   :  { %1083 = vmatpush.xpose.msra.mxu2 %v2967_v32  ;;  %1045 = vmatpush.xpose.msra.mxu0 %v2969_v19 }
 0x210   :  { %1103 = vmatpush.xpose.msra.mxu3 %v2968_v35  ;;  %1065 = vmatpush.xpose.msra.mxu1 %v2970_v21 }
 0x213   :  { %1084 = vmatpush.xpose.msra.mxu2 %v2971_v28  ;;  %1046 = vmatpush.xpose.msra.mxu0 %v2973_v30 }
 0x214   :  { %1104 = vmatpush.xpose.msra.mxu3 %v2972_v29  ;;  %1066 = vmatpush.xpose.msra.mxu1 %v2974_v31 }
 0x217   :  { %1085 = vmatpush.xpose.msra.mxu2 %v2975_v33  ;;  %1047 = vmatpush.xpose.msra.mxu0 %v2977_v40 }
 0x218   :  { %1105 = vmatpush.xpose.msra.mxu3 %v2976_v34  ;;  %1067 = vmatpush.xpose.msra.mxu1 %v2978_v41 }
 0x21b   :  { %1086 = vmatpush.xpose.msra.mxu2 %v2979_v44  ;;  %1048 = vmatpush.xpose.msra.mxu0 %v2981_v51 }
 0x21c   :  { %1106 = vmatpush.xpose.msra.mxu3 %v2980_v42  ;;  %1068 = vmatpush.xpose.msra.mxu1 %v2982_v52  ;;  %v2989_v52 = vld [vmem:[#allocation19_spill] sm:$0xff] }
 0x21f   :  { %1087 = vmatpush.xpose.msra.mxu2 %v2983_v54  ;;  %1049 = vmatpush.xpose.msra.mxu0 %v2985_v59 }
 0x220   :  { %1107 = vmatpush.xpose.msra.mxu3 %v2984_v55  ;;  %1069 = vmatpush.xpose.msra.mxu1 %v2986_v61 }
 0x223   :  { %1088 = vmatpush.xpose.msra.mxu2 %v2987_v3  ;;  %1050 = vmatpush.xpose.msra.mxu0 %v2467_v11  ;;  %v821_v11 = vpop.f32.mrf.mxu1 }
 0x224   :  { %1108 = vmatpush.xpose.msra.mxu3 %v2988_v6  ;;  %1070 = vmatpush.xpose.msra.mxu1 %v2471_v27  ;;  %v801_v27 = vpop.f32.mrf.mxu0 }
 0x225   :  { %v822_v10 = vadd.f32 %v821_v11, %v801_v27 }
 0x227   :  { %1089 = vmatpush.xpose.msra.mxu2 %v2477_v2  ;;  %1051 = vmatpush.xpose.msra.mxu0 %v2483_v48  ;;  %v841_v48 = vpop.f32.mrf.mxu2 }
 0x228   :  { %1109 = vmatpush.xpose.msra.mxu3 %v2480_v1  ;;  %1071 = vmatpush.xpose.msra.mxu1 %v2487_v36  ;;  %v861_v36 = vpop.f32.mrf.mxu3  ;;  %v842_v18 = vadd.f32 %v841_v48, %v822_v10 }
 0x22a   :  { %1052 = vmatmul.f32.vlgmr.msra.gmra.mxu0 %v2931_v58 }
 0x22b   :  { %1090 = vmatpush.xpose.msra.mxu2 %v2494_v63  ;;  %1072 = vmatmul.f32.vlgmr.msra.gmra.mxu1 %v2933_v60  ;;  %v901_v1 = vpop.f32.mrf.mxu1 }
 0x22c   :  { %1110 = vmatpush.xpose.msra.mxu3 %v2498_v5  ;;  %v881_v2 = vpop.f32.mrf.mxu0 }
 0x22d   :  { %v902_v58 = vadd.f32 %v901_v1, %v881_v2 }
 0x22f   :  { %1091 = vmatpush.xpose.msra.mxu2 %v2506_v9 }
 0x230   :  { %1111 = vmatpush.xpose.msra.mxu3 %v2510_v12  ;;  %v862_v12 = vadd.f32 %v861_v36, %v842_v18 }
 0x232   :  { %1092 = vmatmul.f32.vlgmr.msra.gmra.mxu2 %v2940_v20 }
 0x233   :  { %1112 = vmatmul.f32.vlgmr.msra.gmra.mxu3 %v2942_v23 }
 0x235   :  { %v921_v63 = vpop.f32.mrf.mxu2 }
 0x236   :  { %v922_v8 = vadd.f32 %v921_v63, %v902_v58 }
 0x238   :  { %v941_v5 = vpop.f32.mrf.mxu3 }
 0x239   :  { %v942_v60 = vadd.f32 %v941_v5, %v922_v8 }
 0x23b   :  { %v946_v9 = vrot.slane %v942_v60, 7 }
 0x23d   :  { %v948_v20 = vsel %vm947_vm13, %v862_v12, %v946_v9 }
 0x23e   :  { %v950_v23 = vsub.f32 %v111_v22, %v948_v20 }
 0x240   :  { %v952_v38 = vperm.slane %v950_v23, 0  ;;  %v953_v61 = vperm.slane %v950_v23, 1 }
 0x267   :  { %v973_v37 = vpop.f32.mrf.mxu0 }
 0x268   :  { %v974_v39 = vadd.f32 %v973_v37, %v952_v38 }
 0x26a   :  { %v993_v43 = vpop.f32.mrf.mxu1 }
 0x26b   :  { %v994_v57 = vadd.f32 %v993_v43, %v974_v39 }
 0x275   :  { %v1013_v26 = vpop.f32.mrf.mxu2 }
 0x276   :  { %v1014_v53 = vadd.f32 %v1013_v26, %v994_v57  ;;  %v145_v26 = vld [vmem:[#allocation8 + $0x168] sm:$0xff] }
 0x278   :  { %v1033_v62 = vpop.f32.mrf.mxu3 }
 0x279   :  { %v1034_v14 = vadd.f32 %v1033_v62, %v1014_v53  ;;  %v143_v62 = vld [vmem:[#allocation8 + $0x150] sm:$0xff] }
 0x27b   :  { %v1116_v16 = vmin.f32 %v1034_v14, 20.0 }
 0x27d   :  { %v1118_v17 = vmul.f32 1.442695, %v1116_v16 }
 0x27f   :  { %1645 = vpow2.f32 %v1118_v17  ;;  %v141_v17 = vld [vmem:[#allocation8 + $0x138] sm:$0xff] }
 0x285   :  { %v1646_v24 = vpop.eup %1645 }
 0x286   :  { %v1122_v49 = vadd.f32 2.0, %v1646_v24 }
 0x288   :  { %v1124_v50 = vmul.f32 %v1646_v24, %v1122_v49 }
 0x28a   :  { %v1128_v56 = vadd.f32 2.0, %v1124_v50  ;;  %v1126_v4 = vmul.f32 %v1124_v50, %v1034_v14 }
 0x28c   :  { %1647 = vrcp.f32 %v1128_v56  ;;  %v1141_v47 = vand.u32 2147483648, %v1128_v56  ;;  %v1139_v25 = vand.u32 2147483647, %v1128_v56  ;;  %vm1135_vm15 = vweird.f32 %v1128_v56 }
 0x28e   :  { %v1142_v0 = vor.u32 1.1754944e-38, %v1141_v47  ;;  %vm1140_vm1 = vcmp.eq.f32.partialorder %v1139_v25, 8.507059e+37 }
 0x292   :  { %v1648_v13 = vpop.eup %1647 }
 0x293   :  { %v1131_v15 = vmul.f32 %v1648_v13, %v1128_v56  ;;  %vm1136_vm14 = vweird.f32 %v1648_v13 }
 0x294   :  { %vm1137_vm0 = vmor %vm1135_vm15, %vm1136_vm14 }
 0x295   :  { %v1132_v45 = vsub.f32 1.0, %v1131_v15 }
 0x297   :  { %v1133_v46 = vmul.f32 %v1648_v13, %v1132_v45 }
 0x299   :  { %v1134_v7 = vadd.f32 %v1648_v13, %v1133_v46 }
 0x29b   :  { %v1138_v32 = vsel %vm1137_vm0, %v1648_v13, %v1134_v7  ;;  %v139_v13 = vld [vmem:[#allocation8 + $0x120] sm:$0xff]  ;;  %v137_v7 = vld [vmem:[#allocation8 + $0x108] sm:$0xff] }
 0x29c   :  { %v1143_v35 = vsel %vm1140_vm1, %v1142_v0, %v1138_v32 }
 0x29d   :  { %v2649_v19 = vmul.f32 %v1143_v35, %v1126_v4 }
 0x29f   :  { %v1160_v21 = vrot.slane %v2649_v19, 4  ;;  %v1174_v28 = vmul.f32 %v2649_v19, %v2649_v19 }
 0x2a1   :  { %v1161_v29 = vadd.f32 %v1160_v21, %v2649_v19  ;;  %v1176_v30 = vrot.slane %v1174_v28, 4 }
 0x2a3   :  { %v1162_v31 = vrot.slane %v1161_v29, 2  ;;  %v1177_v33 = vadd.f32 %v1176_v30, %v1174_v28  ;;  %v135_v28 = vld [vmem:[#allocation8 + $0xf0] sm:$0xff] }
 0x2a5   :  { %v1163_v34 = vadd.f32 %v1162_v31, %v1161_v29  ;;  %v1178_v40 = vrot.slane %v1177_v33, 2 }
 0x2a7   :  { %v1164_v41 = vrot.slane %v1163_v34, 1  ;;  %v1179_v44 = vadd.f32 %v1178_v40, %v1177_v33  ;;  %v1053_v59 = vpop.f32.mrf.mxu0  ;;  %v133_v40 = vld [vmem:[#allocation8 + $0xd8] sm:$0xff] }
 0x2a8   :  { %v1054_v27 = vadd.f32 %v1053_v59, %v953_v61  ;;  %v1073_v36 = vpop.f32.mrf.mxu1  ;;  %v131_v59 = vld [vmem:[#allocation8 + $0xc0] sm:$0xff] }
 0x2a9   :  { %v1165_v42 = vadd.f32 %v1164_v41, %v1163_v34  ;;  %v1180_v51 = vrot.slane %v1179_v44, 1 }
 0x2aa   :  { %v1074_v2 = vadd.f32 %v1073_v36, %v1054_v27 }
 0x2ab   :  { %v2656_v54 = vmul.f32 %v1165_v42, %v2989_v52  ;;  %v1181_v55 = vadd.f32 %v1180_v51, %v1179_v44 }
 0x2ad   :  { %v1188_v3 = vmul.f32 %v1181_v55, %v2989_v52  ;;  %v1190_v6 = vmul.f32 %v2656_v54, %v2656_v54 }
 0x2af   :  { %v1192_v11 = vsub.f32 %v1188_v3, %v1190_v6 }
 0x2b1   :  { %v1194_v48 = vmax.f32 %v1192_v11, 0.0 }
 0x2b3   :  { %v1196_v1 = vadd.f32 1e-05, %v1194_v48  ;;  %v129_v48 = vld [vmem:[#allocation8 + $0xa8] sm:$0xff] }
 0x2b5   :  { %v1093_v63 = vpop.f32.mrf.mxu2  ;;  %1649 = vrsqrt.f32 %v1196_v1  ;;  %vm1204_vm3 = vweird.f32 %v1196_v1 }
 0x2b6   :  { %v1094_v58 = vadd.f32 %v1093_v63, %v1074_v2  ;;  %v1113_v8 = vpop.f32.mrf.mxu3 }
 0x2b8   :  { %v1114_v5 = vadd.f32 %v1113_v8, %v1094_v58  ;;  %v127_v8 = vld [vmem:[#allocation8 + $0x90] sm:$0xff] }
 0x2ba   :  { %v1117_v10 = vmin.f32 %v1114_v5, 20.0 }
 0x2bb   :  { %v1650_v18 = vpop.eup %1649 }
 0x2bc   :  { %v1120_v60 = vmul.f32 1.442695, %v1117_v10  ;;  %v1199_v9 = vmul.f32 %v1650_v18, %v1196_v1  ;;  %vm1205_vm2 = vweird.f32 %v1650_v18 }
 0x2bd   :  { %vm1206_vm4 = vmor %vm1204_vm3, %vm1205_vm2 }
 0x2be   :  { %1651 = vpow2.f32 %v1120_v60  ;;  %v1200_v12 = vmul.f32 %v1650_v18, %v1199_v9 }
 0x2c0   :  { %v1201_v22 = vmul.f32 0.5, %v1200_v12 }
 0x2c2   :  { %v1202_v23 = vsub.f32 1.5, %v1201_v22  ;;  %v123_v22 = vld [vmem:[#allocation8 + $0x60] sm:$0xff] }
 0x2c4   :  { %v1652_v20 = vpop.eup %1651  ;;  %v1203_v38 = vmul.f32 %v1650_v18, %v1202_v23  ;;  %v121_v23 = vld [vmem:[#allocation8 + $0x48] sm:$0xff] }
 0x2c5   :  { %v1123_v37 = vadd.f32 2.0, %v1652_v20 }
 0x2c6   :  { %v2661_v43 = vsel %vm1206_vm4, %v1650_v18, %v1203_v38  ;;  %v125_v18 = vld [vmem:[#allocation8 + $0x78] sm:$0xff] }
 0x2c7   :  { %v1125_v39 = vmul.f32 %v1652_v20, %v1123_v37  ;;  %v1248_v53 = vmul.f32 %v2661_v43, %v145_v26  ;;  %v1246_v14 = vmul.f32 %v2661_v43, %v143_v62  ;;  %v1244_v50 = vmul.f32 %v2661_v43, %v141_v17  ;;  %v119_v26 = vld [vmem:[#allocation8 + $0x30] sm:$0xff] }
 0x2c8   :  { %v1242_v46 = vmul.f32 %v2661_v43, %v139_v13  ;;  %v1240_v21 = vmul.f32 %v2661_v43, %v137_v7  ;;  %v1238_v34 = vmul.f32 %v2661_v43, %v135_v28  ;;  %v1236_v55 = vmul.f32 %v2661_v43, %v133_v40  ;;  %v140_v7 = vld [vmem:[#allocation8 + $0x128] sm:$0xff]  ;;  %v126_v40 = vld [vmem:[#allocation8 + $0x80] sm:$0xff] }
 0x2c9   :  { %v1129_v57 = vadd.f32 2.0, %v1125_v39  ;;  %1250 = vmatpush.xpose.msrb.mxu0 %v1248_v53  ;;  %1294 = vmatpush.xpose.msrb.mxu2 %v1248_v53  ;;  %v1127_v0 = vmul.f32 %v1125_v39, %v1114_v5  ;;  %v1234_v11 = vmul.f32 %v2661_v43, %v131_v59  ;;  %v1232_v58 = vmul.f32 %v2661_v43, %v129_v48  ;;  %v132_v28 = vld [vmem:[#allocation8 + $0xc8] sm:$0xff]  ;;  %v120_v59 = vld [vmem:[#allocation8 + $0x38] sm:$0xff] }
 0x2ca   :  { %v1230_v60 = vmul.f32 %v2661_v43, %v127_v8  ;;  %v1228_v12 = vmul.f32 %v2661_v43, %v125_v18  ;;  %v1226_v20 = vmul.f32 %v2661_v43, %v123_v22  ;;  %v1224_v39 = vmul.f32 %v2661_v43, %v121_v23 }
 0x2cb   :  { %1653 = vrcp.f32 %v1129_v57  ;;  %v1155_v56 = vand.u32 2147483648, %v1129_v57  ;;  %v1153_v45 = vand.u32 2147483647, %v1129_v57  ;;  %vm1149_vm6 = vweird.f32 %v1129_v57 }
 0x2cc   :  { %v1222_v62 = vmul.f32 %v2661_v43, %v119_v26 }
 0x2cd   :  { %1251 = vmatpush.xpose.msrb.mxu0 %v1246_v14  ;;  %1295 = vmatpush.xpose.msrb.mxu2 %v1246_v14  ;;  %v1156_v25 = vor.u32 1.1754944e-38, %v1155_v56  ;;  %vm1154_vm8 = vcmp.eq.f32.partialorder %v1153_v45, 8.507059e+37  ;;  %v115_v56 = vld [vmem:[#allocation8] sm:$0xff] }
 0x2ce   :  { %v1218_v45 = vmul.f32 %v2661_v43, %v115_v56 }
 0x2d1   :  { %v1654_v16 = vpop.eup %1653  ;;  %1252 = vmatpush.xpose.msrb.mxu0 %v1244_v50  ;;  %1296 = vmatpush.xpose.msrb.mxu2 %v1244_v50 }
 0x2d2   :  { %v1145_v24 = vmul.f32 %v1654_v16, %v1129_v57  ;;  %vm1150_vm5 = vweird.f32 %v1654_v16 }
 0x2d3   :  { %vm1151_vm7 = vmor %vm1149_vm6, %vm1150_vm5 }
 0x2d4   :  { %v1146_v49 = vsub.f32 1.0, %v1145_v24  ;;  %v146_v24 = vld [vmem:[#allocation8 + $0x170] sm:$0xff] }
 0x2d5   :  { %1253 = vmatpush.xpose.msrb.mxu0 %v1242_v46  ;;  %1297 = vmatpush.xpose.msrb.mxu2 %v1242_v46  ;;  %v142_v46 = vld [vmem:[#allocation8 + $0x140] sm:$0xff] }
 0x2d6   :  { %v1147_v15 = vmul.f32 %v1654_v16, %v1146_v49 }
 0x2d8   :  { %v1148_v47 = vadd.f32 %v1654_v16, %v1147_v15  ;;  %v144_v15 = vld [vmem:[#allocation8 + $0x158] sm:$0xff] }
 0x2d9   :  { %1254 = vmatpush.xpose.msrb.mxu0 %v1240_v21  ;;  %1298 = vmatpush.xpose.msrb.mxu2 %v1240_v21 }
 0x2da   :  { %v1152_v4 = vsel %vm1151_vm7, %v1654_v16, %v1148_v47  ;;  %v117_v16 = vld [vmem:[#allocation8 + $0x18] sm:$0xff] }
 0x2db   :  { %v1157_v32 = vsel %vm1154_vm8, %v1156_v25, %v1152_v4  ;;  %v1220_v49 = vmul.f32 %v2661_v43, %v117_v16 }
 0x2dc   :  { %v2667_v35 = vmul.f32 %v1157_v32, %v1127_v0  ;;  %v138_v0 = vld [vmem:[#allocation8 + $0x110] sm:$0xff]  ;;  %v136_v32 = vld [vmem:[#allocation8 + $0xf8] sm:$0xff] }
 0x2dd   :  { %1255 = vmatpush.xpose.msrb.mxu0 %v1238_v34  ;;  %1299 = vmatpush.xpose.msrb.mxu2 %v1238_v34 }
 0x2de   :  { %v1166_v29 = vrot.slane %v2667_v35, 4  ;;  %v1175_v30 = vmul.f32 %v2667_v35, %v2667_v35 }
 0x2e0   :  { %v1167_v31 = vadd.f32 %v1166_v29, %v2667_v35  ;;  %v1182_v33 = vrot.slane %v1175_v30, 4 }
 0x2e1   :  { %1256 = vmatpush.xpose.msrb.mxu0 %v1236_v55  ;;  %1300 = vmatpush.xpose.msrb.mxu2 %v1236_v55 }
 0x2e2   :  { %v1168_v41 = vrot.slane %v1167_v31, 2  ;;  %v1183_v44 = vadd.f32 %v1182_v33, %v1175_v30  ;;  %v130_v30 = vld [vmem:[#allocation8 + $0xb0] sm:$0xff]  ;;  %v128_v33 = vld [vmem:[#allocation8 + $0x98] sm:$0xff] }
 0x2e4   :  { %v1169_v42 = vadd.f32 %v1168_v41, %v1167_v31  ;;  %v1184_v51 = vrot.slane %v1183_v44, 2 }
 0x2e5   :  { %1257 = vmatpush.xpose.msrb.mxu0 %v1234_v11  ;;  %1301 = vmatpush.xpose.msrb.mxu2 %v1234_v11 }
 0x2e6   :  { %v1170_v61 = vrot.slane %v1169_v42, 1  ;;  %v1185_v3 = vadd.f32 %v1184_v51, %v1183_v44  ;;  %v124_v44 = vld [vmem:[#allocation8 + $0x68] sm:$0xff]  ;;  %v122_v51 = vld [vmem:[#allocation8 + $0x50] sm:$0xff] }
 0x2e8   :  { %v1171_v6 = vadd.f32 %v1170_v61, %v1169_v42  ;;  %v1186_v27 = vrot.slane %v1185_v3, 1 }
 0x2e9   :  { %1258 = vmatpush.xpose.msrb.mxu0 %v1232_v58  ;;  %1302 = vmatpush.xpose.msrb.mxu2 %v1232_v58 }
 0x2ea   :  { %v2678_v36 = vmul.f32 %v1171_v6, %v2989_v52  ;;  %v1187_v2 = vadd.f32 %v1186_v27, %v1185_v3  ;;  %v118_v3 = vld [vmem:[#allocation8 + $0x20] sm:$0xff]  ;;  %v116_v27 = vld [vmem:[#allocation8 + $0x8] sm:$0xff] }
 0x2ec   :  { %v1189_v1 = vmul.f32 %v1187_v2, %v2989_v52  ;;  %v1191_v63 = vmul.f32 %v2678_v36, %v2678_v36  ;;  %v112_v2 = vld [vmem:[#allocation10 + $0x6] sm:$0x1] }
 0x2ed   :  { %1259 = vmatpush.xpose.msrb.mxu0 %v1230_v60  ;;  %1303 = vmatpush.xpose.msrb.mxu2 %v1230_v60 }
 0x2ee   :  { %v1193_v5 = vsub.f32 %v1189_v1, %v1191_v63 }
 0x2f0   :  { %v1195_v10 = vmax.f32 %v1193_v5, 0.0 }
 0x2f1   :  { %1260 = vmatpush.xpose.msrb.mxu0 %v1228_v12  ;;  %1304 = vmatpush.xpose.msrb.mxu2 %v1228_v12 }
 0x2f2   :  { %v1197_v9 = vadd.f32 1e-05, %v1195_v10 }
 0x2f4   :  { %1655 = vrsqrt.f32 %v1197_v9  ;;  %vm1214_vm10 = vweird.f32 %v1197_v9 }
 0x2f5   :  { %1261 = vmatpush.xpose.msrb.mxu0 %v1226_v20  ;;  %1305 = vmatpush.xpose.msrb.mxu2 %v1226_v20 }
 0x2f9   :  { %1262 = vmatpush.xpose.msrb.mxu0 %v1224_v39  ;;  %1306 = vmatpush.xpose.msrb.mxu2 %v1224_v39 }
 0x2fa   :  { %v1656_v37 = vpop.eup %1655 }
 0x2fb   :  { %v1209_v38 = vmul.f32 %v1656_v37, %v1197_v9  ;;  %vm1215_vm9 = vweird.f32 %v1656_v37 }
 0x2fc   :  { %vm1216_vm11 = vmor %vm1214_vm10, %vm1215_vm9 }
 0x2fd   :  { %v1210_v57 = vmul.f32 %v1656_v37, %v1209_v38  ;;  %1263 = vmatpush.xpose.msrb.mxu0 %v1222_v62  ;;  %1307 = vmatpush.xpose.msrb.mxu2 %v1222_v62 }
 0x2ff   :  { %v1211_v53 = vmul.f32 0.5, %v1210_v57 }
 0x301   :  { %v1212_v14 = vsub.f32 1.5, %v1211_v53  ;;  %1264 = vmatpush.xpose.msrb.mxu0 %v1220_v49  ;;  %1308 = vmatpush.xpose.msrb.mxu2 %v1220_v49 }
 0x303   :  { %v1213_v17 = vmul.f32 %v1656_v37, %v1212_v14 }
 0x305   :  { %v2690_v50 = vsel %vm1216_vm11, %v1656_v37, %v1213_v17  ;;  %1265 = vmatpush.xpose.msrb.mxu0 %v1218_v45  ;;  %1309 = vmatpush.xpose.msrb.mxu2 %v1218_v45 }
 0x306   :  { %v1249_v13 = vmul.f32 %v2690_v50, %v146_v24  ;;  %v1247_v47 = vmul.f32 %v2690_v50, %v144_v15  ;;  %v1245_v25 = vmul.f32 %v2690_v50, %v142_v46  ;;  %v1243_v43 = vmul.f32 %v2690_v50, %v140_v7 }
 0x307   :  { %v1241_v4 = vmul.f32 %v2690_v50, %v138_v0  ;;  %v1239_v21 = vmul.f32 %v2690_v50, %v136_v32  ;;  %v1235_v29 = vmul.f32 %v2690_v50, %v132_v28  ;;  %v1233_v31 = vmul.f32 %v2690_v50, %v130_v30 }
 0x308   :  { %1270 = vmatpush.xpose.msrb.mxu1 %v1249_v13  ;;  %1314 = vmatpush.xpose.msrb.mxu3 %v1249_v13  ;;  %v1231_v34 = vmul.f32 %v2690_v50, %v128_v33  ;;  %v1229_v41 = vmul.f32 %v2690_v50, %v126_v40  ;;  %v1227_v42 = vmul.f32 %v2690_v50, %v124_v44  ;;  %v162_v44 = vld [vmem:[#allocation8 + $0x178] sm:$0xff] }
 0x309   :  { %1266 = vmatmul.f32.vlgmr.msrb.gmra.mxu0 %v2656_v54  ;;  %1310 = vmatmul.f32.vlgmr.msrb.gmra.mxu2 %v2649_v19  ;;  %v134_v54 = vld [vmem:[#allocation8 + $0xe0] sm:$0xff]  ;;  %v1225_v55 = vmul.f32 %v2690_v50, %v122_v51  ;;  %v1223_v61 = vmul.f32 %v2690_v50, %v120_v59  ;;  %v1221_v6 = vmul.f32 %v2690_v50, %v118_v3 }
 0x30a   :  { %v1237_v19 = vmul.f32 %v2690_v50, %v134_v54  ;;  %v1219_v11 = vmul.f32 %v2690_v50, %v116_v27 }
 0x30c   :  { %1271 = vmatpush.xpose.msrb.mxu1 %v1247_v47  ;;  %1315 = vmatpush.xpose.msrb.mxu3 %v1247_v47 }
 0x310   :  { %1272 = vmatpush.xpose.msrb.mxu1 %v1245_v25  ;;  %1316 = vmatpush.xpose.msrb.mxu3 %v1245_v25 }
 0x314   :  { %1273 = vmatpush.xpose.msrb.mxu1 %v1243_v43  ;;  %1317 = vmatpush.xpose.msrb.mxu3 %v1243_v43 }
 0x318   :  { %1274 = vmatpush.xpose.msrb.mxu1 %v1241_v4  ;;  %1318 = vmatpush.xpose.msrb.mxu3 %v1241_v4 }
 0x31c   :  { %1275 = vmatpush.xpose.msrb.mxu1 %v1239_v21  ;;  %1319 = vmatpush.xpose.msrb.mxu3 %v1239_v21 }
 0x320   :  { %1276 = vmatpush.xpose.msrb.mxu1 %v1237_v19  ;;  %1320 = vmatpush.xpose.msrb.mxu3 %v1237_v19 }
 0x324   :  { %1277 = vmatpush.xpose.msrb.mxu1 %v1235_v29  ;;  %1321 = vmatpush.xpose.msrb.mxu3 %v1235_v29 }
 0x328   :  { %1278 = vmatpush.xpose.msrb.mxu1 %v1233_v31  ;;  %1322 = vmatpush.xpose.msrb.mxu3 %v1233_v31 }
 0x32c   :  { %1279 = vmatpush.xpose.msrb.mxu1 %v1231_v34  ;;  %1323 = vmatpush.xpose.msrb.mxu3 %v1231_v34 }
 0x330   :  { %1280 = vmatpush.xpose.msrb.mxu1 %v1229_v41  ;;  %1324 = vmatpush.xpose.msrb.mxu3 %v1229_v41 }
 0x334   :  { %1281 = vmatpush.xpose.msrb.mxu1 %v1227_v42  ;;  %1325 = vmatpush.xpose.msrb.mxu3 %v1227_v42 }
 0x338   :  { %1282 = vmatpush.xpose.msrb.mxu1 %v1225_v55  ;;  %1326 = vmatpush.xpose.msrb.mxu3 %v1225_v55  ;;  %v161_v55 = vld [vmem:[#allocation8 + $0x160] sm:$0xff] }
 0x33c   :  { %1283 = vmatpush.xpose.msrb.mxu1 %v1223_v61  ;;  %1327 = vmatpush.xpose.msrb.mxu3 %v1223_v61  ;;  %v160_v61 = vld [vmem:[#allocation8 + $0x148] sm:$0xff] }
 0x340   :  { %1284 = vmatpush.xpose.msrb.mxu1 %v1221_v6  ;;  %1328 = vmatpush.xpose.msrb.mxu3 %v1221_v6  ;;  %v159_v6 = vld [vmem:[#allocation8 + $0x130] sm:$0xff] }
 0x344   :  { %1285 = vmatpush.xpose.msrb.mxu1 %v1219_v11  ;;  %1329 = vmatpush.xpose.msrb.mxu3 %v1219_v11  ;;  %v158_v11 = vld [vmem:[#allocation8 + $0x118] sm:$0xff] }
 0x347   :  { %1286 = vmatmul.f32.vlgmr.msrb.gmra.mxu1 %v2678_v36  ;;  %1330 = vmatmul.f32.vlgmr.msrb.gmra.mxu3 %v2667_v35 }
 0x386   :  { %v1267_v48 = vpop.f32.mrf.mxu0 }
 0x38c   :  { %v1311_v5 = vpop.f32.mrf.mxu2 }
 0x3c4   :  { %v1287_v1 = vpop.f32.mrf.mxu1 }
 0x3c5   :  { %v1288_v63 = vadd.f32 %v1287_v1, %v1267_v48 }
 0x3c7   :  { %v1290_v58 = vsub.f32 %v112_v2, %v1288_v63  ;;  %v157_v2 = vld [vmem:[#allocation8 + $0x100] sm:$0xff]  ;;  %v156_v63 = vld [vmem:[#allocation8 + $0xe8] sm:$0xff] }
 0x3c9   :  { %v1292_v8 = vperm.slane %v1290_v58, 0 }
 0x3ca   :  { %v1331_v60 = vpop.f32.mrf.mxu3 }
 0x3cb   :  { %v1312_v10 = vadd.f32 %v1311_v5, %v1292_v8  ;;  %v155_v8 = vld [vmem:[#allocation8 + $0xd0] sm:$0xff] }
 0x3cd   :  { %v1332_v18 = vadd.f32 %v1331_v60, %v1312_v10  ;;  %v154_v10 = vld [vmem:[#allocation8 + $0xb8] sm:$0xff] }
 0x3cf   :  { %v1334_v9 = vmin.f32 %v1332_v18, 20.0 }
 0x3d1   :  { %v1335_v12 = vmul.f32 1.442695, %v1334_v9 }
 0x3d3   :  { %1657 = vpow2.f32 %v1335_v12  ;;  %v152_v12 = vld [vmem:[#allocation8 + $0x88] sm:$0xff] }
 0x3d9   :  { %v1658_v22 = vpop.eup %1657 }
 0x3da   :  { %v1337_v20 = vadd.f32 2.0, %v1658_v22 }
 0x3dc   :  { %v1338_v23 = vmul.f32 %v1658_v22, %v1337_v20  ;;  %v151_v20 = vld [vmem:[#allocation8 + $0x70] sm:$0xff] }
 0x3de   :  { %v1340_v37 = vadd.f32 2.0, %v1338_v23  ;;  %v1339_v14 = vmul.f32 %v1338_v23, %v1332_v18  ;;  %v153_v18 = vld [vmem:[#allocation8 + $0xa0] sm:$0xff] }
 0x3e0   :  { %1659 = vrcp.f32 %v1340_v37  ;;  %v1352_v39 = vand.u32 2147483648, %v1340_v37  ;;  %v1350_v26 = vand.u32 2147483647, %v1340_v37  ;;  %vm1346_vm14 = vweird.f32 %v1340_v37 }
 0x3e2   :  { %v1353_v62 = vor.u32 1.1754944e-38, %v1352_v39  ;;  %vm1351_vm0 = vcmp.eq.f32.partialorder %v1350_v26, 8.507059e+37  ;;  %v148_v39 = vld [vmem:[#allocation8 + $0x28] sm:$0xff]  ;;  %v147_v26 = vld [vmem:[#allocation8 + $0x10] sm:$0xff] }
 0x3e6   :  { %v1660_v36 = vpop.eup %1659 }
 0x3e7   :  { %v1342_v35 = vmul.f32 %v1660_v36, %v1340_v37  ;;  %vm1347_vm12 = vweird.f32 %v1660_v36  ;;  %v150_v37 = vld [vmem:[#allocation8 + $0x58] sm:$0xff] }
 0x3e8   :  { %vm1348_vm15 = vmor %vm1346_vm14, %vm1347_vm12 }
 0x3e9   :  { %v1343_v38 = vsub.f32 1.0, %v1342_v35  ;;  %v149_v35 = vld [vmem:[#allocation8 + $0x40] sm:$0xff] }
 0x3eb   :  { %v1344_v57 = vmul.f32 %v1660_v36, %v1343_v38 }
 0x3ed   :  { %v1345_v53 = vadd.f32 %v1660_v36, %v1344_v57 }
 0x3ef   :  { %v1349_v16 = vsel %vm1348_vm15, %v1660_v36, %v1345_v53 }
 0x3f0   :  { %v1354_v17 = vsel %vm1351_vm0, %v1353_v62, %v1349_v16  ;;  %v113_v62 = vld [vmem:[#allocation10 + $0x7] sm:$0x1] }
 0x3f1   :  { %v2713_v24 = vmul.f32 %v1354_v17, %v1339_v14 }
 0x3f3   :  { %v1356_v49 = vrot.slane %v2713_v24, 4  ;;  %v1363_v50 = vmul.f32 %v2713_v24, %v2713_v24 }
 0x3f5   :  { %v1357_v56 = vadd.f32 %v1356_v49, %v2713_v24  ;;  %v1364_v13 = vrot.slane %v1363_v50, 4 }
 0x3f7   :  { %v1358_v15 = vrot.slane %v1357_v56, 2  ;;  %v1365_v45 = vadd.f32 %v1364_v13, %v1363_v50 }
 0x3f9   :  { %v1359_v47 = vadd.f32 %v1358_v15, %v1357_v56  ;;  %v1366_v46 = vrot.slane %v1365_v45, 2 }
 0x3fb   :  { %v1360_v25 = vrot.slane %v1359_v47, 1  ;;  %v1367_v7 = vadd.f32 %v1366_v46, %v1365_v45 }
 0x3fd   :  { %v1361_v43 = vadd.f32 %v1360_v25, %v1359_v47  ;;  %v1368_v0 = vrot.slane %v1367_v7, 1 }
 0x3ff   :  { %v2720_v4 = vmul.f32 %v1361_v43, %v2989_v52  ;;  %v1369_v32 = vadd.f32 %v1368_v0, %v1367_v7 }
 0x401   :  { %v1370_v21 = vmul.f32 %v1369_v32, %v2989_v52  ;;  %v1371_v54 = vmul.f32 %v2720_v4, %v2720_v4 }
 0x403   :  { %v1372_v19 = vsub.f32 %v1370_v21, %v1371_v54 }
 0x405   :  { %v1373_v28 = vmax.f32 %v1372_v19, 0.0 }
 0x407   :  { %v1374_v29 = vadd.f32 1e-05, %v1373_v28 }
 0x409   :  { %1661 = vrsqrt.f32 %v1374_v29  ;;  %vm1381_vm2 = vweird.f32 %v1374_v29 }
 0x40f   :  { %v1662_v30 = vpop.eup %1661 }
 0x410   :  { %v1376_v31 = vmul.f32 %v1662_v30, %v1374_v29  ;;  %vm1382_vm1 = vweird.f32 %v1662_v30 }
 0x411   :  { %vm1383_vm3 = vmor %vm1381_vm2, %vm1382_vm1 }
 0x412   :  { %v1377_v33 = vmul.f32 %v1662_v30, %v1376_v31 }
 0x414   :  { %v1378_v34 = vmul.f32 0.5, %v1377_v33 }
 0x416   :  { %v1379_v40 = vsub.f32 1.5, %v1378_v34 }
 0x418   :  { %v1380_v41 = vmul.f32 %v1662_v30, %v1379_v40 }
 0x41a   :  { %v1384_v42 = vsel %vm1383_vm3, %v1662_v30, %v1380_v41 }
 0x41b   :  { %v1400_v51 = vmul.f32 %v1384_v42, %v162_v44  ;;  %v1399_v59 = vmul.f32 %v1384_v42, %v161_v55  ;;  %v1398_v3 = vmul.f32 %v1384_v42, %v160_v61  ;;  %v1397_v27 = vmul.f32 %v1384_v42, %v159_v6 }
 0x41c   :  { %v1396_v48 = vmul.f32 %v1384_v42, %v158_v11  ;;  %v1395_v1 = vmul.f32 %v1384_v42, %v157_v2  ;;  %v1394_v58 = vmul.f32 %v1384_v42, %v156_v63  ;;  %v1393_v5 = vmul.f32 %v1384_v42, %v155_v8 }
 0x41d   :  { %1401 = vmatpush.xpose.msra.mxu0 %v1400_v51  ;;  %1425 = vmatpush.xpose.msra.mxu1 %v1400_v51  ;;  %v1392_v60 = vmul.f32 %v1384_v42, %v154_v10  ;;  %v1391_v9 = vmul.f32 %v1384_v42, %v153_v18  ;;  %v1390_v22 = vmul.f32 %v1384_v42, %v152_v12 }
 0x41e   :  { %v1389_v23 = vmul.f32 %v1384_v42, %v151_v20  ;;  %v1388_v36 = vmul.f32 %v1384_v42, %v150_v37  ;;  %v1387_v38 = vmul.f32 %v1384_v42, %v149_v35  ;;  %v1386_v57 = vmul.f32 %v1384_v42, %v148_v39 }
 0x41f   :  { %v1385_v53 = vmul.f32 %v1384_v42, %v147_v26 }
 0x421   :  { %1402 = vmatpush.xpose.msra.mxu0 %v1399_v59  ;;  %1426 = vmatpush.xpose.msra.mxu1 %v1399_v59 }
 0x425   :  { %1403 = vmatpush.xpose.msra.mxu0 %v1398_v3  ;;  %1427 = vmatpush.xpose.msra.mxu1 %v1398_v3 }
 0x429   :  { %1404 = vmatpush.xpose.msra.mxu0 %v1397_v27  ;;  %1428 = vmatpush.xpose.msra.mxu1 %v1397_v27 }
 0x42d   :  { %1405 = vmatpush.xpose.msra.mxu0 %v1396_v48  ;;  %1429 = vmatpush.xpose.msra.mxu1 %v1396_v48 }
 0x431   :  { %1406 = vmatpush.xpose.msra.mxu0 %v1395_v1  ;;  %1430 = vmatpush.xpose.msra.mxu1 %v1395_v1 }
 0x435   :  { %1407 = vmatpush.xpose.msra.mxu0 %v1394_v58  ;;  %1431 = vmatpush.xpose.msra.mxu1 %v1394_v58 }
 0x439   :  { %1408 = vmatpush.xpose.msra.mxu0 %v1393_v5  ;;  %1432 = vmatpush.xpose.msra.mxu1 %v1393_v5 }
 0x43d   :  { %1409 = vmatpush.xpose.msra.mxu0 %v1392_v60  ;;  %1433 = vmatpush.xpose.msra.mxu1 %v1392_v60  ;;  %v114_v60 = vld [vmem:[#allocation10 + $0x8] sm:$0x1] }
 0x441   :  { %1410 = vmatpush.xpose.msra.mxu0 %v1391_v9  ;;  %1434 = vmatpush.xpose.msra.mxu1 %v1391_v9 }
 0x445   :  { %1411 = vmatpush.xpose.msra.mxu0 %v1390_v22  ;;  %1435 = vmatpush.xpose.msra.mxu1 %v1390_v22 }
 0x449   :  { %1412 = vmatpush.xpose.msra.mxu0 %v1389_v23  ;;  %1436 = vmatpush.xpose.msra.mxu1 %v1389_v23 }
 0x44d   :  { %1413 = vmatpush.xpose.msra.mxu0 %v1388_v36  ;;  %1437 = vmatpush.xpose.msra.mxu1 %v1388_v36  ;;  %v1502_v36 = vstv %s1497_s4 }
 0x451   :  { %1414 = vmatpush.xpose.msra.mxu0 %v1387_v38  ;;  %1438 = vmatpush.xpose.msra.mxu1 %v1387_v38 }
 0x455   :  { %1415 = vmatpush.xpose.msra.mxu0 %v1386_v57  ;;  %1439 = vmatpush.xpose.msra.mxu1 %v1386_v57 }
 0x459   :  { %1416 = vmatpush.xpose.msra.mxu0 %v1385_v53  ;;  %1440 = vmatpush.xpose.msra.mxu1 %v1385_v53 }
 0x45c   :  { %1417 = vmatmul.f32.vlgmr.msra.gmra.mxu0 %v2720_v4  ;;  %1441 = vmatmul.f32.vlgmr.msra.gmra.mxu1 %v2713_v24 }
 0x4d9   :  { %v1418_v14 = vpop.f32.mrf.mxu0  ;;  %v1442_v49 = vpop.f32.mrf.mxu1 }
 0x4da   :  { %v1421_v16 = vsub.f32 %v113_v62, %v1418_v14 }
 0x4dc   :  { %v1423_v17 = vperm.slane %v1421_v16, 0 }
 0x4de   :  { %v1443_v50 = vadd.f32 %v1442_v49, %v1423_v17 }
 0x4e0   :  { %v1445_v56 = vmin.f32 %v1443_v50, 20.0 }
 0x4e2   :  { %v1446_v13 = vmul.f32 1.442695, %v1445_v56 }
 0x4e4   :  { %1663 = vpow2.f32 %v1446_v13 }
 0x4ea   :  { %v1664_v15 = vpop.eup %1663 }
 0x4eb   :  { %v1448_v45 = vadd.f32 2.0, %v1664_v15 }
 0x4ed   :  { %v1449_v47 = vmul.f32 %v1664_v15, %v1448_v45 }
 0x4ef   :  { %v1451_v46 = vadd.f32 2.0, %v1449_v47  ;;  %v1450_v54 = vmul.f32 %v1449_v47, %v1443_v50 }
 0x4f1   :  { %1665 = vrcp.f32 %v1451_v46  ;;  %v1463_v0 = vand.u32 2147483648, %v1451_v46  ;;  %v1461_v24 = vand.u32 2147483647, %v1451_v46  ;;  %vm1457_vm5 = vweird.f32 %v1451_v46 }
 0x4f3   :  { %v1464_v21 = vor.u32 1.1754944e-38, %v1463_v0  ;;  %vm1462_vm7 = vcmp.eq.f32.partialorder %v1461_v24, 8.507059e+37 }
 0x4f7   :  { %v1666_v25 = vpop.eup %1665 }
 0x4f8   :  { %v1453_v7 = vmul.f32 %v1666_v25, %v1451_v46  ;;  %vm1458_vm4 = vweird.f32 %v1666_v25 }
 0x4f9   :  { %vm1459_vm6 = vmor %vm1457_vm5, %vm1458_vm4 }
 0x4fa   :  { %v1454_v43 = vsub.f32 1.0, %v1453_v7 }
 0x4fc   :  { %v1455_v4 = vmul.f32 %v1666_v25, %v1454_v43 }
 0x4fe   :  { %v1456_v32 = vadd.f32 %v1666_v25, %v1455_v4 }
 0x500   :  { %v1460_v19 = vsel %vm1459_vm6, %v1666_v25, %v1456_v32  ;;  %vm1594_vm6 = vcmask 7168  }
 0x501   :  { %v1465_v28 = vsel %vm1462_vm7, %v1464_v21, %v1460_v19 }
 0x502   :  { %v1466_v29 = vmul.f32 %v1465_v28, %v1450_v54 }
 0x504   :  { %v1474_v30 = vmul.f32 %v1466_v29, %v1466_v29  ;;  %v1467_v31 = vrot.slane %v1466_v29, 4 }
 0x506   :  { %v1475_v33 = vrot.slane %v1474_v30, 4  ;;  %v1468_v34 = vadd.f32 %v1467_v31, %v1466_v29 }
 0x508   :  { %v1476_v40 = vadd.f32 %v1475_v33, %v1474_v30  ;;  %v1469_v41 = vrot.slane %v1468_v34, 2 }
 0x50a   :  { %v1470_v44 = vadd.f32 %v1469_v41, %v1468_v34  ;;  %v1477_v42 = vrot.slane %v1476_v40, 2 }
 0x50c   :  { %v1471_v51 = vrot.slane %v1470_v44, 1  ;;  %v1478_v55 = vadd.f32 %v1477_v42, %v1476_v40 }
 0x50e   :  { %v1472_v59 = vadd.f32 %v1471_v51, %v1470_v44  ;;  %v1479_v61 = vrot.slane %v1478_v55, 1 }
 0x510   :  { %v1473_v3 = vmul.f32 %v1472_v59, %v2989_v52  ;;  %v1480_v6 = vadd.f32 %v1479_v61, %v1478_v55 }
 0x512   :  { %v1481_v27 = vmul.f32 %v1480_v6, %v2989_v52  ;;  %v1482_v11 = vmul.f32 %v1473_v3, %v1473_v3 }
 0x514   :  { %v1483_v48 = vsub.f32 %v1481_v27, %v1482_v11 }
 0x516   :  { %v1484_v2 = vmax.f32 %v1483_v48, 0.0 }
 0x518   :  { %v1485_v1 = vadd.f32 1e-05, %v1484_v2  ;;  %v1564_v2 = vstv %s1604_s5 }
 0x51a   :  { %1667 = vrsqrt.f32 %v1485_v1  ;;  %vm1492_vm9 = vweird.f32 %v1485_v1 }
 0x520   :  { %v1668_v63 = vpop.eup %1667 }
 0x521   :  { %v1487_v58 = vmul.f32 %v1668_v63, %v1485_v1  ;;  %vm1493_vm8 = vweird.f32 %v1668_v63 }
 0x522   :  { %vm1494_vm10 = vmor %vm1492_vm9, %vm1493_vm8 }
 0x523   :  { %v1488_v8 = vmul.f32 %v1668_v63, %v1487_v58 }
 0x525   :  { %v1489_v5 = vmul.f32 0.5, %v1488_v8 }
 0x527   :  { %v1490_v10 = vsub.f32 1.5, %v1489_v5 }
 0x529   :  { %v1491_v18 = vmul.f32 %v1668_v63, %v1490_v10 }
 0x52b   :  { %v1495_v9 = vsel %vm1494_vm10, %v1668_v63, %v1491_v18 }
 0x52c   :  { %v1496_v12 = vmul.f32 %v1495_v9, %v114_v60 }
 0x52e   :  { %v1498_v22 = vmul.f32 %v1496_v12, %v1473_v3  ;;  %v1505_v23 = vperm.slane %v1496_v12, 0 }
 0x530   :  { %v1499_v20 = vsel %vm947_vm13, %v1498_v22, 0.0  ;;  %v1507_v37 = vmul.f32 %v1505_v23, %v1466_v29 }
 0x531   :  { %1500 = vadd.xlane.f32.xlu0 %v1499_v20 }
 0x539   :  { %1508 = vadd.xlane.f32.xlu0 %v1507_v37 }
 0x5a4   :  { %v1501_v35 = vpop.xlane.xlu0 %1500 }
 0x5a5   :  { %v1503_v38 = vsub.f32 %v1502_v36, %v1501_v35 }
 0x5a7   :  { %v1510_v39 = vperm.slane %v1503_v38, 0 }
 0x5ac   :  { %v1509_v57 = vpop.xlane.xlu0 %1508 }
 0x5ad   :  { %v1511_v26 = vadd.f32 %v1510_v39, %v1509_v57 }
 0x5af   :  { %v1512_v53 = vmin.f32 %v1511_v26, 20.0 }
 0x5b1   :  { %v1513_v62 = vmul.f32 1.442695, %v1512_v53 }
 0x5b3   :  { %1669 = vpow2.f32 %v1513_v62 }
 0x5b9   :  { %v1670_v14 = vpop.eup %1669 }
 0x5ba   :  { %v1515_v16 = vadd.f32 2.0, %v1670_v14 }
 0x5bc   :  { %v1516_v17 = vmul.f32 %v1670_v14, %v1515_v16 }
 0x5be   :  { %v1518_v49 = vadd.f32 2.0, %v1516_v17  ;;  %v1517_v7 = vmul.f32 %v1516_v17, %v1511_v26 }
 0x5c0   :  { %1671 = vrcp.f32 %v1518_v49  ;;  %v1530_v15 = vand.u32 2147483648, %v1518_v49  ;;  %v1528_v47 = vand.u32 2147483647, %v1518_v49  ;;  %vm1524_vm11 = vweird.f32 %v1518_v49 }
 0x5c2   :  { %v1531_v25 = vor.u32 1.1754944e-38, %v1530_v15  ;;  %vm1529_vm14 = vcmp.eq.f32.partialorder %v1528_v47, 8.507059e+37 }
 0x5c6   :  { %v1672_v50 = vpop.eup %1671 }
 0x5c7   :  { %v1520_v56 = vmul.f32 %v1672_v50, %v1518_v49  ;;  %vm1525_vm13 = vweird.f32 %v1672_v50 }
 0x5c8   :  { %vm1526_vm12 = vmor %vm1524_vm11, %vm1525_vm13 }
 0x5c9   :  { %v1521_v13 = vsub.f32 1.0, %v1520_v56 }
 0x5cb   :  { %v1522_v45 = vmul.f32 %v1672_v50, %v1521_v13 }
 0x5cd   :  { %v1523_v46 = vadd.f32 %v1672_v50, %v1522_v45 }
 0x5cf   :  { %v1527_v43 = vsel %vm1526_vm12, %v1672_v50, %v1523_v46 }
 0x5d0   :  { %v1532_v0 = vsel %vm1529_vm14, %v1531_v25, %v1527_v43 }
 0x5d1   :  { %v1533_v4 = vmul.f32 %v1532_v0, %v1517_v7 }
 0x5d3   :  { %v1534_v24 = vrot.slane %v1533_v4, 4  ;;  %v1541_v32 = vmul.f32 %v1533_v4, %v1533_v4 }
 0x5d5   :  { %v1535_v21 = vadd.f32 %v1534_v24, %v1533_v4  ;;  %v1542_v54 = vrot.slane %v1541_v32, 4 }
 0x5d7   :  { %v1536_v19 = vrot.slane %v1535_v21, 2  ;;  %v1543_v28 = vadd.f32 %v1542_v54, %v1541_v32 }
 0x5d9   :  { %v1537_v29 = vadd.f32 %v1536_v19, %v1535_v21  ;;  %v1544_v30 = vrot.slane %v1543_v28, 2 }
 0x5db   :  { %v1538_v31 = vrot.slane %v1537_v29, 1  ;;  %v1545_v33 = vadd.f32 %v1544_v30, %v1543_v28 }
 0x5dd   :  { %v1539_v34 = vadd.f32 %v1538_v31, %v1537_v29  ;;  %v1546_v40 = vrot.slane %v1545_v33, 1 }
 0x5df   :  { %v1540_v41 = vmul.f32 %v1539_v34, %v2989_v52  ;;  %v1547_v44 = vadd.f32 %v1546_v40, %v1545_v33 }
 0x5e1   :  { %v1548_v42 = vmul.f32 %v1547_v44, %v2989_v52  ;;  %v1549_v51 = vmul.f32 %v1540_v41, %v1540_v41  ;;  %v1568_v52 = vstv %s1605_s28 }
 0x5e3   :  { %v1550_v55 = vsub.f32 %v1548_v42, %v1549_v51 }
 0x5e5   :  { %v1551_v59 = vmax.f32 %v1550_v55, 0.0 }
 0x5e7   :  { %v1552_v61 = vadd.f32 1e-05, %v1551_v59 }
 0x5e9   :  { %1673 = vrsqrt.f32 %v1552_v61  ;;  %vm1559_vm0 = vweird.f32 %v1552_v61 }
 0x5ef   :  { %v1674_v3 = vpop.eup %1673 }
 0x5f0   :  { %v1554_v6 = vmul.f32 %v1674_v3, %v1552_v61  ;;  %vm1560_vm15 = vweird.f32 %v1674_v3 }
 0x5f1   :  { %vm1561_vm1 = vmor %vm1559_vm0, %vm1560_vm15 }
 0x5f2   :  { %v1555_v27 = vmul.f32 %v1674_v3, %v1554_v6 }
 0x5f4   :  { %v1556_v11 = vmul.f32 0.5, %v1555_v27 }
 0x5f6   :  { %v1557_v48 = vsub.f32 1.5, %v1556_v11 }
 0x5f8   :  { %v1558_v1 = vmul.f32 %v1674_v3, %v1557_v48 }
 0x5fa   :  { %v1562_v63 = vsel %vm1561_vm1, %v1674_v3, %v1558_v1 }
 0x5fb   :  { %v1565_v58 = vmul.f32 %v1564_v2, %v1562_v63 }
 0x5fd   :  { %v1567_v8 = vmul.f32 %v1565_v58, %v1540_v41  ;;  %v1570_v10 = vmul.f32 %v1565_v58, %v1533_v4 }
 0x5ff   :  { %v1569_v5 = vsub.f32 %v1568_v52, %v1567_v8 }
 0x601   :  { %v1571_v60 = vadd.f32 %v1570_v10, %v1569_v5 }
 0x603   :  { %v1572_v18 = vand.u32 2147483647, %v1571_v60  ;;  %vm1591_vm7 = vcmp.ge.f32.partialorder %v1571_v60, 0.0 }
 0x605   :  { %v1573_v9 = vsub.f32 0.0, %v1572_v18 }
 0x607   :  { %v1574_v12 = vmul.f32 1.442695, %v1573_v9 }
 0x609   :  { %1675 = vpow2.f32 %v1574_v12 }
 0x60f   :  { %v1676_v22 = vpop.eup %1675 }
 0x610   :  { %v1576_v20 = vadd.f32 1.0, %v1676_v22 }
 0x612   :  { %1677 = vrcp.f32 %v1576_v20  ;;  %v1588_v35 = vand.u32 2147483648, %v1576_v20  ;;  %v1586_v39 = vand.u32 2147483647, %v1576_v20  ;;  %vm1582_vm3 = vweird.f32 %v1576_v20 }
 0x614   :  { %v1589_v26 = vor.u32 1.1754944e-38, %v1588_v35  ;;  %vm1587_vm5 = vcmp.eq.f32.partialorder %v1586_v39, 8.507059e+37 }
 0x618   :  { %v1678_v23 = vpop.eup %1677 }
 0x619   :  { %v1578_v37 = vmul.f32 %v1678_v23, %v1576_v20  ;;  %vm1583_vm2 = vweird.f32 %v1678_v23 }
 0x61a   :  { %vm1584_vm4 = vmor %vm1582_vm3, %vm1583_vm2 }
 0x61b   :  { %v1579_v36 = vsub.f32 1.0, %v1578_v37 }
 0x61d   :  { %v1580_v38 = vmul.f32 %v1678_v23, %v1579_v36 }
 0x61f   :  { %v1581_v57 = vadd.f32 %v1678_v23, %v1580_v38 }
 0x621   :  { %v1585_v53 = vsel %vm1584_vm4, %v1678_v23, %v1581_v57 }
 0x622   :  { %v1590_v62 = vsel %vm1587_vm5, %v1589_v26, %v1585_v53 }
 0x623   :  { %v1592_v14 = vmul.f32 %v1676_v22, %v1590_v62 }
 0x625   :  { %v1593_v16 = vsel %vm1591_vm7, %v1590_v62, %v1592_v14 }
 0x626   :  { %1595 = vst.msk [vmem:[%s2741_s6] sm:$0xff] %vm1594_vm6, %v1593_v16 }
 0x627   :  { %1600 = vsyncpa [#allocation3], 1 }
 0x628   :  { %1601 = vsyncpa [#allocation6], 1 }
 0x629   :  { %1602 = vsyncpa [#allocation9], 1 }
 0x62a   :  { %1603 = vsyncpa [#allocation4], 1 }

</bundles_post_ra>
